<compile_context>
chip_gen: v6e
topology: v6e:2x2x1
jax: 0.10.0
libtpu: 0.0.40
codegen_flags: <defaults>
</compile_context>

<pallas_src>
import jax
import jax.numpy as jnp
from jax.experimental import pallas as pl
from jax.experimental.pallas import tpu as pltpu


_NEG_BIG = -1e30  # bias for padded expert lanes: exp(_NEG_BIG - max) underflows to 0


def gating_kernel(x_ref, w1_ref, w2_ref, wf_ref, vec_ref, bf_ref, out_ref):
    eps = 1e-5  # matches PyTorch nn.LayerNorm default

    def ln_relu(h, g, b):
        # Two-pass LayerNorm (centered variance): robust to large |mean|.
        mu = jnp.mean(h, axis=-1, keepdims=True)
        d = h - mu
        var = jnp.mean(d * d, axis=-1, keepdims=True)
        hn = d * jax.lax.rsqrt(var + eps)
        return jnp.maximum(hn * g + b, 0.0)

    # Packed LN/bias rows (f32): 0=b1 1=g1 2=be1 3=b2 4=g2 5=be2 (rows 6,7 pad).
    vecs = vec_ref[...]

    # ---- feature_extractor block 1: Linear -> LayerNorm -> ReLU (-> Dropout=id)
    x = x_ref[...].astype(jnp.bfloat16)                       # cast in-kernel (VPU free)
    h = jnp.dot(x, w1_ref[...], preferred_element_type=jnp.float32) + vecs[0:1, :]
    h = ln_relu(h, vecs[1:2, :], vecs[2:3, :])                # f32

    # ---- feature_extractor block 2
    h = jnp.dot(h.astype(jnp.bfloat16), w2_ref[...],
                preferred_element_type=jnp.float32) + vecs[3:4, :]
    h = ln_relu(h, vecs[4:5, :], vecs[5:6, :])                # f32

    # ---- MHA (seq_len=1 -> attn weight == 1) + output layer, folded offline:
    #      logits = h2 @ (Wv Wo Wout) + ((bv Wo + bo) Wout + bout)
    logits = jnp.dot(h.astype(jnp.bfloat16), wf_ref[...],
                     preferred_element_type=jnp.float32) + bf_ref[...]

    # ---- softmax over experts (padded lanes carry -1e30 bias -> exact prob 0).
    m = jnp.max(logits, axis=-1, keepdims=True)
    e = jnp.exp(logits - m)
    s = jnp.sum(e, axis=-1, keepdims=True)
    out_ref[...] = (e / s).astype(out_ref.dtype)              # exact divide


def prepare_params(params):
    """Offline prep: fold the attention tail into one matmul, pad experts to a
    lane-dense width (multiple of 128), pack LN/bias rows into a single (8, H)
    operand, and cast MXU weight operands to bf16."""
    H = params["w2"].shape[0]
    E = params["wout"].shape[1]
    e_pad = max(128, ((E + 127) // 128) * 128)

    wf = params["wv"] @ params["wo"] @ params["wout"]                          # (H, E)
    bf = (params["bv"] @ params["wo"] + params["bo"]) @ params["wout"] + params["bout"]

    wf_pad = jnp.zeros((H, e_pad), jnp.float32).at[:, :E].set(wf)
    bf_pad = jnp.full((1, e_pad), _NEG_BIG, jnp.float32).at[:, :E].set(bf)

    vecs = jnp.zeros((8, H), jnp.float32)
    vecs = (vecs.at[0].set(params["b1"][0]).at[1].set(params["g1"][0])
                .at[2].set(params["be1"][0]).at[3].set(params["b2"][0])
                .at[4].set(params["g2"][0]).at[5].set(params["be2"][0]))

    return {
        "w1": params["w1"].astype(jnp.bfloat16),
        "w2": params["w2"].astype(jnp.bfloat16),
        "wf": wf_pad.astype(jnp.bfloat16),
        "vecs": vecs,          # stays f32 (LayerNorm math is f32)
        "bf": bf_pad,          # stays f32 (-1e30 padded lanes)
        "num_experts": E,
        "e_pad": e_pad,
    }


def gating_network_pallas(x, prep, *, block_b=None):
    B, IN = x.shape
    H = prep["w2"].shape[0]
    E = prep["num_experts"]
    E_PAD = prep["e_pad"]
    # Note: for best MXU/lane utilization of the first matmul, IN should be a
    # multiple of 128 (it is in the demo); otherwise x/W1 could be zero-padded
    # offline, at the cost of an extra wrapper-side pass over x.

    if block_b is None:
        # Overhead-dominated kernel: one big tile on single-TC chips (v5e/v6e);
        # for large B use >=2 steps of 512 rows so v7x megacore shards the
        # batch axis and step i+1's DMA overlaps step i's compute.
        block_b = B if B <= 1024 else 512
    block_b = min(block_b, B)
    n_steps = pl.cdiv(B, block_b)
    grid = (n_steps,)
    # If B % block_b != 0, the padded rows of the last tile flow through
    # rsqrt/exp on undefined data; those rows are row-local and discarded by
    # the wrapper slice, so this is benign.

    # Constant operands: index_map is grid-invariant so they are fetched once;
    # for multi-step grids drop them to a single VMEM buffer (no point
    # double-buffering weights that never change -- keeps resident VMEM in
    # check on v7x's 64 MiB as H/E grow).
    const_mode = pl.Buffered(1) if n_steps > 1 else None

    def const_spec(r, c):
        return pl.BlockSpec((r, c), lambda i: (0, 0), pipeline_mode=const_mode)

    in_specs = [
        pl.BlockSpec((block_b, IN), lambda i: (i, 0)),   # x batch tile (f32)
        const_spec(IN, H),                               # W1 (bf16)
        const_spec(H, H),                                # W2 (bf16)
        const_spec(H, E_PAD),                            # folded Wv@Wo@Wout (bf16)
        const_spec(8, H),                                # packed LN/bias rows (f32)
        const_spec(1, E_PAD),                            # folded bias (f32)
    ]
    out_spec = pl.BlockSpec((block_b, E_PAD), lambda i: (i, 0))

    flops = 2 * B * (IN * H + H * H + H * E_PAD)
    transcendentals = B * (E_PAD + 2)        # exp per lane + 2 rsqrt per row
    bytes_accessed = (B * IN * 4                                  # x (f32 read)
                      + (IN * H + H * H + H * E_PAD) * 2          # bf16 weights
                      + (8 * H + E_PAD) * 4                       # small f32 vectors
                      + B * E_PAD * 2)                            # bf16 output

    out_padded = pl.pallas_call(
        gating_kernel,
        out_shape=jax.ShapeDtypeStruct((B, E_PAD), jnp.bfloat16),
        grid_spec=pltpu.PrefetchScalarGridSpec(
            num_scalar_prefetch=0,
            grid=grid,
            in_specs=in_specs,
            out_specs=out_spec,
        ),
        compiler_params=pltpu.CompilerParams(
            dimension_semantics=("parallel",),
            vmem_limit_bytes=32 * 1024 * 1024,
        ),
        cost_estimate=pl.CostEstimate(
            flops=flops,
            transcendentals=transcendentals,
            bytes_accessed=bytes_accessed,
        ),
    )(x, prep["w1"], prep["w2"], prep["wf"], prep["vecs"], prep["bf"])

    return out_padded[:, :E]


def init_params(key, input_size, hidden, num_experts):
    ks = jax.random.split(key, 8)
    scale = 0.05

    def rnd(k, shape):
        return (scale * jax.random.normal(k, shape)).astype(jnp.float32)

    # Stored already transposed to (in_features, out_features); bias rows (1, F).
    return {
        "w1": rnd(ks[0], (input_size, hidden)),
        "b1": rnd(ks[1], (1, hidden)),
        "g1": jnp.ones((1, hidden), jnp.float32),
        "be1": jnp.zeros((1, hidden), jnp.float32),
        "w2": rnd(ks[2], (hidden, hidden)),
        "b2": rnd(ks[3], (1, hidden)),
        "g2": jnp.ones((1, hidden), jnp.float32),
        "be2": jnp.zeros((1, hidden), jnp.float32),
        # value slice of MHA in_proj (q/k slices drop out for seq_len=1)
        "wv": rnd(ks[4], (hidden, hidden)),
        "bv": rnd(ks[5], (1, hidden)),
        "wo": rnd(ks[6], (hidden, hidden)),
        "bo": jnp.zeros((1, hidden), jnp.float32),
        "wout": rnd(ks[7], (hidden, num_experts)),
        "bout": jnp.zeros((1, num_experts), jnp.float32),
    }


def gating_network_ref(x, p):
    """Pure-JAX f32 reference (un-fused, matches the PyTorch module at eval)."""
    eps = 1e-5

    def ln(h, g, b):
        mu = jnp.mean(h, axis=-1, keepdims=True)
        var = jnp.mean((h - mu) ** 2, axis=-1, keepdims=True)
        return (h - mu) / jnp.sqrt(var + eps) * g + b

    h = jnp.maximum(ln(x @ p["w1"] + p["b1"], p["g1"], p["be1"]), 0.0)
    h = jnp.maximum(ln(h @ p["w2"] + p["b2"], p["g2"], p["be2"]), 0.0)
    v = h @ p["wv"] + p["bv"]
    a = v @ p["wo"] + p["bo"]
    logits = a @ p["wout"] + p["bout"]
    return jax.nn.softmax(logits, axis=-1)


if __name__ == "__main__":
    # hidden divisible by 4 attention heads; IN a multiple of 128 so x / the
    # first matmul's K dim are lane-dense. block_b defaults to B -> grid of 1.
    B, INPUT_SIZE, HIDDEN, NUM_EXPERTS = 256, 128, 128, 8

    key = jax.random.PRNGKey(0)
    kx, kp = jax.random.split(key)
    x = jax.random.normal(kx, (B, INPUT_SIZE), dtype=jnp.float32)
    params = init_params(kp, INPUT_SIZE, HIDDEN, NUM_EXPERTS)
    prep = prepare_params(params)

    out = gating_network_pallas(x, prep)
    out = jax.block_until_ready(out)

    ref = gating_network_ref(x, params)
    assert out.shape == (B, NUM_EXPERTS)

    out32 = out.astype(jnp.float32)
    # bf16 output quantization (~5e-4/elem) is the only row-sum error source now
    # that the softmax divide is exact.
    row_sum_err = float(jnp.max(jnp.abs(jnp.sum(out32, axis=-1) - 1.0)))
    assert row_sum_err < 5e-3, row_sum_err
    max_err = float(jnp.max(jnp.abs(out32 - ref)))
    assert max_err < 1e-2, max_err

    print("KERNEL_OK")
</pallas_src>

<mosaic_0001>
module attributes {stable_mosaic.version = 11 : i64} {
  func.func @gating_kernel(%arg0: i32, %arg1: memref<256x128xf32, #tpu.memory_space<vmem>>, %arg2: memref<128x128xbf16, #tpu.memory_space<vmem>>, %arg3: memref<128x128xbf16, #tpu.memory_space<vmem>>, %arg4: memref<128x128xbf16, #tpu.memory_space<vmem>>, %arg5: memref<8x128xf32, #tpu.memory_space<vmem>>, %arg6: memref<1x128xf32, #tpu.memory_space<vmem>>, %arg7: memref<256x128xbf16, #tpu.memory_space<vmem>>) attributes {dimension_semantics = [#tpu.dimension_semantics<parallel>], iteration_bounds = array<i64: 1>, scalar_prefetch = 0 : i64, scratch_operands = 0 : i64, tpu.core_type = #tpu.core_type<tc>, window_params = [{transform_indices = @transform_0, window_bounds = array<i64: 256, 128>}, {pipeline_mode = #tpu.pipeline_mode<synchronous>, transform_indices = @transform_1, window_bounds = array<i64: 128, 128>}, {pipeline_mode = #tpu.pipeline_mode<synchronous>, transform_indices = @transform_2, window_bounds = array<i64: 128, 128>}, {pipeline_mode = #tpu.pipeline_mode<synchronous>, transform_indices = @transform_3, window_bounds = array<i64: 128, 128>}, {pipeline_mode = #tpu.pipeline_mode<synchronous>, transform_indices = @transform_4, window_bounds = array<i64: 8, 128>}, {pipeline_mode = #tpu.pipeline_mode<synchronous>, transform_indices = @transform_5, window_bounds = array<i64: 1, 128>}, {transform_indices = @transform_6, window_bounds = array<i64: 256, 128>}]} {
    %c0 = arith.constant 0 : index
    %c0_0 = arith.constant 0 : index
    %0 = vector.load %arg5[%c0, %c0_0] : memref<8x128xf32, #tpu.memory_space<vmem>>, vector<8x128xf32>
    %c0_1 = arith.constant 0 : index
    %c0_2 = arith.constant 0 : index
    %1 = vector.load %arg1[%c0_1, %c0_2] : memref<256x128xf32, #tpu.memory_space<vmem>>, vector<256x128xf32>
    %2 = arith.truncf %1 : vector<256x128xf32> to vector<256x128xbf16>
    %c0_3 = arith.constant 0 : index
    %c0_4 = arith.constant 0 : index
    %3 = vector.load %arg2[%c0_3, %c0_4] : memref<128x128xbf16, #tpu.memory_space<vmem>>, vector<128x128xbf16>
    %cst = arith.constant dense<0.000000e+00> : vector<256x128xf32>
    %4 = tpu.matmul %2, %3, %cst {dimension_numbers = #tpu.dot_dimension_numbers<[1], [0], [0], [1], [0, 0, 1, 1], [], []>} : vector<256x128xbf16>, vector<128x128xbf16>, vector<256x128xf32> -> vector<256x128xf32>
    %5 = vector.extract_strided_slice %0 {offsets = [0, 0], sizes = [1, 128], strides = [1, 1]} : vector<8x128xf32> to vector<1x128xf32>
    %6 = vector.broadcast %5 : vector<1x128xf32> to vector<256x128xf32>
    %7 = arith.addf %4, %6 : vector<256x128xf32>
    %8 = vector.extract_strided_slice %0 {offsets = [1, 0], sizes = [1, 128], strides = [1, 1]} : vector<8x128xf32> to vector<1x128xf32>
    %9 = vector.extract_strided_slice %0 {offsets = [2, 0], sizes = [1, 128], strides = [1, 1]} : vector<8x128xf32> to vector<1x128xf32>
    %cst_5 = arith.constant dense<0.000000e+00> : vector<256xf32>
    %10 = vector.multi_reduction <add>, %7, %cst_5 [1] : vector<256x128xf32> to vector<256xf32>
    %11 = vector.shape_cast %10 : vector<256xf32> to vector<256x1xf32>
    %cst_6 = arith.constant 1.280000e+02 : f32
    %12 = vector.broadcast %cst_6 : f32 to vector<256x1xf32>
    %13 = arith.divf %11, %12 : vector<256x1xf32>
    %14 = vector.broadcast %13 : vector<256x1xf32> to vector<256x128xf32>
    %15 = arith.subf %7, %14 : vector<256x128xf32>
    %16 = arith.mulf %15, %15 : vector<256x128xf32>
    %cst_7 = arith.constant dense<0.000000e+00> : vector<256xf32>
    %17 = vector.multi_reduction <add>, %16, %cst_7 [1] : vector<256x128xf32> to vector<256xf32>
    %18 = vector.shape_cast %17 : vector<256xf32> to vector<256x1xf32>
    %cst_8 = arith.constant 1.280000e+02 : f32
    %19 = vector.broadcast %cst_8 : f32 to vector<256x1xf32>
    %20 = arith.divf %18, %19 : vector<256x1xf32>
    %cst_9 = arith.constant 9.99999974E-6 : f32
    %21 = vector.broadcast %cst_9 : f32 to vector<256x1xf32>
    %22 = arith.addf %20, %21 : vector<256x1xf32>
    %23 = math.rsqrt %22 : vector<256x1xf32>
    %24 = vector.broadcast %23 : vector<256x1xf32> to vector<256x128xf32>
    %25 = arith.mulf %15, %24 : vector<256x128xf32>
    %26 = vector.broadcast %8 : vector<1x128xf32> to vector<256x128xf32>
    %27 = arith.mulf %25, %26 : vector<256x128xf32>
    %28 = vector.broadcast %9 : vector<1x128xf32> to vector<256x128xf32>
    %29 = arith.addf %27, %28 : vector<256x128xf32>
    %cst_10 = arith.constant 0.000000e+00 : f32
    %30 = vector.broadcast %cst_10 : f32 to vector<256x128xf32>
    %31 = arith.maximumf %29, %30 : vector<256x128xf32>
    %32 = arith.truncf %31 : vector<256x128xf32> to vector<256x128xbf16>
    %c0_11 = arith.constant 0 : index
    %c0_12 = arith.constant 0 : index
    %33 = vector.load %arg3[%c0_11, %c0_12] : memref<128x128xbf16, #tpu.memory_space<vmem>>, vector<128x128xbf16>
    %cst_13 = arith.constant dense<0.000000e+00> : vector<256x128xf32>
    %34 = tpu.matmul %32, %33, %cst_13 {dimension_numbers = #tpu.dot_dimension_numbers<[1], [0], [0], [1], [0, 0, 1, 1], [], []>} : vector<256x128xbf16>, vector<128x128xbf16>, vector<256x128xf32> -> vector<256x128xf32>
    %35 = vector.extract_strided_slice %0 {offsets = [3, 0], sizes = [1, 128], strides = [1, 1]} : vector<8x128xf32> to vector<1x128xf32>
    %36 = vector.broadcast %35 : vector<1x128xf32> to vector<256x128xf32>
    %37 = arith.addf %34, %36 : vector<256x128xf32>
    %38 = vector.extract_strided_slice %0 {offsets = [4, 0], sizes = [1, 128], strides = [1, 1]} : vector<8x128xf32> to vector<1x128xf32>
    %39 = vector.extract_strided_slice %0 {offsets = [5, 0], sizes = [1, 128], strides = [1, 1]} : vector<8x128xf32> to vector<1x128xf32>
    %cst_14 = arith.constant dense<0.000000e+00> : vector<256xf32>
    %40 = vector.multi_reduction <add>, %37, %cst_14 [1] : vector<256x128xf32> to vector<256xf32>
    %41 = vector.shape_cast %40 : vector<256xf32> to vector<256x1xf32>
    %cst_15 = arith.constant 1.280000e+02 : f32
    %42 = vector.broadcast %cst_15 : f32 to vector<256x1xf32>
    %43 = arith.divf %41, %42 : vector<256x1xf32>
    %44 = vector.broadcast %43 : vector<256x1xf32> to vector<256x128xf32>
    %45 = arith.subf %37, %44 : vector<256x128xf32>
    %46 = arith.mulf %45, %45 : vector<256x128xf32>
    %cst_16 = arith.constant dense<0.000000e+00> : vector<256xf32>
    %47 = vector.multi_reduction <add>, %46, %cst_16 [1] : vector<256x128xf32> to vector<256xf32>
    %48 = vector.shape_cast %47 : vector<256xf32> to vector<256x1xf32>
    %cst_17 = arith.constant 1.280000e+02 : f32
    %49 = vector.broadcast %cst_17 : f32 to vector<256x1xf32>
    %50 = arith.divf %48, %49 : vector<256x1xf32>
    %cst_18 = arith.constant 9.99999974E-6 : f32
    %51 = vector.broadcast %cst_18 : f32 to vector<256x1xf32>
    %52 = arith.addf %50, %51 : vector<256x1xf32>
    %53 = math.rsqrt %52 : vector<256x1xf32>
    %54 = vector.broadcast %53 : vector<256x1xf32> to vector<256x128xf32>
    %55 = arith.mulf %45, %54 : vector<256x128xf32>
    %56 = vector.broadcast %38 : vector<1x128xf32> to vector<256x128xf32>
    %57 = arith.mulf %55, %56 : vector<256x128xf32>
    %58 = vector.broadcast %39 : vector<1x128xf32> to vector<256x128xf32>
    %59 = arith.addf %57, %58 : vector<256x128xf32>
    %cst_19 = arith.constant 0.000000e+00 : f32
    %60 = vector.broadcast %cst_19 : f32 to vector<256x128xf32>
    %61 = arith.maximumf %59, %60 : vector<256x128xf32>
    %62 = arith.truncf %61 : vector<256x128xf32> to vector<256x128xbf16>
    %c0_20 = arith.constant 0 : index
    %c0_21 = arith.constant 0 : index
    %63 = vector.load %arg4[%c0_20, %c0_21] : memref<128x128xbf16, #tpu.memory_space<vmem>>, vector<128x128xbf16>
    %cst_22 = arith.constant dense<0.000000e+00> : vector<256x128xf32>
    %64 = tpu.matmul %62, %63, %cst_22 {dimension_numbers = #tpu.dot_dimension_numbers<[1], [0], [0], [1], [0, 0, 1, 1], [], []>} : vector<256x128xbf16>, vector<128x128xbf16>, vector<256x128xf32> -> vector<256x128xf32>
    %c0_23 = arith.constant 0 : index
    %c0_24 = arith.constant 0 : index
    %65 = vector.load %arg6[%c0_23, %c0_24] : memref<1x128xf32, #tpu.memory_space<vmem>>, vector<1x128xf32>
    %66 = vector.broadcast %65 : vector<1x128xf32> to vector<256x128xf32>
    %67 = arith.addf %64, %66 : vector<256x128xf32>
    %cst_25 = arith.constant dense<0xFF800000> : vector<256xf32>
    %68 = vector.multi_reduction <maximumf>, %67, %cst_25 [1] : vector<256x128xf32> to vector<256xf32>
    %69 = vector.shape_cast %68 : vector<256xf32> to vector<256x1xf32>
    %70 = vector.broadcast %69 : vector<256x1xf32> to vector<256x128xf32>
    %71 = arith.subf %67, %70 : vector<256x128xf32>
    %72 = math.exp %71 : vector<256x128xf32>
    %cst_26 = arith.constant dense<0.000000e+00> : vector<256xf32>
    %73 = vector.multi_reduction <add>, %72, %cst_26 [1] : vector<256x128xf32> to vector<256xf32>
    %74 = vector.shape_cast %73 : vector<256xf32> to vector<256x1xf32>
    %75 = vector.broadcast %74 : vector<256x1xf32> to vector<256x128xf32>
    %76 = arith.divf %72, %75 : vector<256x128xf32>
    %77 = arith.truncf %76 : vector<256x128xf32> to vector<256x128xbf16>
    %c0_27 = arith.constant 0 : index
    %c0_28 = arith.constant 0 : index
    %78 = vector.load %arg7[%c0_27, %c0_28] : memref<256x128xbf16, #tpu.memory_space<vmem>>, vector<256x128xbf16>
    tpu.vector_store %arg7[%c0_27, %c0_28], %77 {strides = array<i32>} : memref<256x128xbf16, #tpu.memory_space<vmem>>, vector<256x128xbf16>,
    return
  }
  func.func @transform_0(%arg0: i32) -> (i32, i32) {
    %c0_i32 = arith.constant 0 : i32
    %c0_i32_0 = arith.constant 0 : i32
    return %arg0, %c0_i32 : i32, i32
  }
  func.func @transform_1(%arg0: i32) -> (i32, i32) {
    %c0_i32 = arith.constant 0 : i32
    %c0_i32_0 = arith.constant 0 : i32
    %c0_i32_1 = arith.constant 0 : i32
    return %c0_i32, %c0_i32_0 : i32, i32
  }
  func.func @transform_2(%arg0: i32) -> (i32, i32) {
    %c0_i32 = arith.constant 0 : i32
    %c0_i32_0 = arith.constant 0 : i32
    %c0_i32_1 = arith.constant 0 : i32
    return %c0_i32, %c0_i32_0 : i32, i32
  }
  func.func @transform_3(%arg0: i32) -> (i32, i32) {
    %c0_i32 = arith.constant 0 : i32
    %c0_i32_0 = arith.constant 0 : i32
    %c0_i32_1 = arith.constant 0 : i32
    return %c0_i32, %c0_i32_0 : i32, i32
  }
  func.func @transform_4(%arg0: i32) -> (i32, i32) {
    %c0_i32 = arith.constant 0 : i32
    %c0_i32_0 = arith.constant 0 : i32
    %c0_i32_1 = arith.constant 0 : i32
    return %c0_i32, %c0_i32_0 : i32, i32
  }
  func.func @transform_5(%arg0: i32) -> (i32, i32) {
    %c0_i32 = arith.constant 0 : i32
    %c0_i32_0 = arith.constant 0 : i32
    %c0_i32_1 = arith.constant 0 : i32
    return %c0_i32, %c0_i32_0 : i32, i32
  }
  func.func @transform_6(%arg0: i32) -> (i32, i32) {
    %c0_i32 = arith.constant 0 : i32
    %c0_i32_0 = arith.constant 0 : i32
    return %arg0, %c0_i32 : i32, i32
  }
}

</mosaic_0001>

<bundles_post_ra>
// kernel: tpu_custom_call.1
= control target key start
LH: loop header
LB: loop body
LE: loop exit
PB: predicated region body
PF: predicated region fallthrough
CT: control target
= control target key end

     0   :  { %11 = vsyncpa [#allocation3], 0  ;;  %s4243_s0 = inlined_call_operand.hbm [shape: f32[256,128], index: 0, kind: input, shape index: {}]   ;;  %s4244_s1 = inlined_call_operand.hbm [shape: bf16[128,128], index: 1, kind: input, shape index: {}]   ;;  %s4245_s2 = inlined_call_operand.hbm [shape: bf16[128,128], index: 2, kind: input, shape index: {}]   ;;  %s4246_s3 = inlined_call_operand.hbm [shape: bf16[128,128], index: 3, kind: input, shape index: {}]   ;;  %s4247_s4 = inlined_call_operand.hbm [shape: f32[8,128], index: 4, kind: input, shape index: {}]   ;;  %s4248_s5 = inlined_call_operand.vmem [shape: f32[1,128], index: 5, kind: input, shape index: {}]   ;;  %s4249_s6 = inlined_call_operand.hbm [shape: bf16[256,128], index: 6, kind: output, shape index: {}]  }
   0x1   :  { %12 = vsyncpa [#allocation6], 0 }
   0x2   :  { %13 = vsyncpa [#allocation9], 0 }
   0x3   :  { %14 = vsyncpa [#allocation4], 0  ;;  %s3077_s21 = smov [#allocation5]  }
   0x4   :  { %s32_s22 = sshll.u32 %s3077_s21, 4  ;;  %s33_s22 = int_to_ptr.vmem [resolvable:$true] %s32_s22 }
   0x5   :  { %s2957_s23 = scalar_lea.vmem %s33_s22, 1024  ;;  %p2962_p1 = scmp.lt.s32.totalorder %s33_s22, %s33_s22 }
   0x6   :  { %p2958_p0 = scmp.ne.s32.totalorder %s33_s22, %s2957_s23  ;;  %p2963_p2 = scmp.lt.s32.totalorder %s2957_s23, %s2957_s23 }
   0x8   :  { %p2964_p3 = por %p2963_p2, %p2962_p1 }
   0xa   :  { %p2965_p4 = pnand %p2964_p3, %p2958_p0 }
   0xc   :  { %2968 = shalt.err (!%p2965_p4)
}
   0xd   :  { %s3078_s24 = smov 64   ;;  %s3079_s25 = smov 4  }
   0xe   :  { %38 = dma.hbm_to_vmem [thread:$0]  %s4244_s1, 1024, %s33_s22, [#allocation6], %s3078_s24, %s3078_s24, %s3079_s25  }
   0xf   :  { %s3080_s28 = smov [#allocation8]   ;;  %s3081_s30 = smov [#allocation2]  }
  0x10   :  { %s56_s29 = sshll.u32 %s3080_s28, 4  ;;  %s20_s7 = sshll.u32 %s3081_s30, 4  ;;  %s57_s29 = int_to_ptr.vmem [resolvable:$true] %s56_s29  ;;  %s21_s7 = int_to_ptr.vmem [resolvable:$true] %s20_s7 }
  0x11   :  { %s2977_s8 = scalar_lea.vmem %s57_s29, 1024  ;;  %p2982_p6 = scmp.lt.s32.totalorder %s57_s29, %s57_s29 }
  0x12   :  { %p2978_p5 = scmp.ne.s32.totalorder %s57_s29, %s2977_s8  ;;  %p2983_p7 = scmp.lt.s32.totalorder %s2977_s8, %s2977_s8 }
  0x14   :  { %p2984_p8 = por %p2983_p7, %p2982_p6 }
  0x16   :  { %p2985_p9 = pnand %p2984_p8, %p2978_p5 }
  0x18   :  { %2988 = shalt.err (!%p2985_p9)
}
  0x19   :  { %62 = dma.hbm_to_vmem [thread:$0]  %s4246_s3, 1024, %s57_s29, [#allocation9], %s3078_s24, %s3078_s24, %s3079_s25  }
  0x1a   :  { %s2997_s1 = scalar_lea.vmem %s21_s7, 4096  ;;  %p3002_p11 = scmp.lt.s32.totalorder %s21_s7, %s21_s7 }
  0x1b   :  { %p2998_p10 = scmp.ne.s32.totalorder %s21_s7, %s2997_s1  ;;  %p3003_p12 = scmp.lt.s32.totalorder %s2997_s1, %s2997_s1 }
  0x1d   :  { %p3004_p13 = por %p3003_p12, %p3002_p11 }
  0x1f   :  { %p3005_p0 = pnand %p3004_p13, %p2998_p10 }
  0x21   :  { %3008 = shalt.err (!%p3005_p0)
}
  0x22   :  { %s3082_s11 = smov 128   ;;  %s3083_s12 = smov 8  }
  0x23   :  { %26 = dma.hbm_to_vmem [thread:$0]  %s4243_s0, 4096, %s21_s7, [#allocation3], %s3082_s11, %s3082_s11, %s3083_s12  }
  0x24   :  { %s3084_s15 = smov [#allocation7]   ;;  %s3085_s17 = smov [#allocation10]  }
  0x25   :  { %s44_s16 = sshll.u32 %s3084_s15, 4  ;;  %s69_s18 = sshll.u32 %s3085_s17, 4  ;;  %s45_s16 = int_to_ptr.vmem [resolvable:$true] %s44_s16  ;;  %s70_s18 = int_to_ptr.vmem [resolvable:$true] %s69_s18 }
  0x26   :  { %s3017_s3 = scalar_lea.vmem %s45_s16, 1024  ;;  %p3022_p2 = scmp.lt.s32.totalorder %s45_s16, %s45_s16 }
  0x27   :  { %p3018_p1 = scmp.ne.s32.totalorder %s45_s16, %s3017_s3  ;;  %p3023_p3 = scmp.lt.s32.totalorder %s3017_s3, %s3017_s3 }
  0x29   :  { %p3024_p4 = por %p3023_p3, %p3022_p2 }
  0x2b   :  { %p3025_p5 = pnand %p3024_p4, %p3018_p1 }
  0x2d   :  { %3028 = shalt.err (!%p3025_p5)
}
  0x2e   :  { %50 = dma.hbm_to_vmem [thread:$0]  %s4245_s2, 1024, %s45_s16, [#allocation6], %s3078_s24, %s3078_s24, %s3079_s25  }
  0x2f   :  { %s3037_s0 = scalar_lea.vmem %s70_s18, 128  ;;  %p3042_p7 = scmp.lt.s32.totalorder %s70_s18, %s70_s18 }
  0x30   :  { %p3038_p6 = scmp.ne.s32.totalorder %s70_s18, %s3037_s0  ;;  %p3043_p8 = scmp.lt.s32.totalorder %s3037_s0, %s3037_s0 }
  0x32   :  { %p3044_p9 = por %p3043_p8, %p3042_p7 }
  0x34   :  { %p3045_p10 = pnand %p3044_p9, %p3038_p6 }
  0x36   :  { %3048 = shalt.err (!%p3045_p10)
}
  0x37   :  { %72 = dma.hbm_to_vmem [thread:$0]  %s4247_s4, 128, %s70_s18, [#allocation9]  }
  0x38   :  { %3069 = dma.done.wait [#allocation3], 4096  }
  0x39   :  { %3070 = vsyncadd [#allocation3], 4294963200 }
  0x3a   :  { %3071 = dma.done.wait [#allocation6], 2048  }
  0x3b   :  { %3072 = vsyncadd [#allocation6], 4294965248 }
  0x3c   :  { %3073 = dma.done.wait [#allocation9], 1152  }
  0x3d   :  { %3074 = vsyncadd [#allocation9], 4294966144  ;;  %v2668_v0 = vld [vmem:[#allocation5 + $0x38] sm:$0xff]   ;;  %v2669_v1 = vld [vmem:[#allocation5 + $0x30] sm:$0xff]   ;;  %v156_v56 = vlaneseq }
  0x3e   :  { %2498 = vmatprep.subr.bf16.mxu0 %v2668_v0  ;;  %2642 = vmatprep.subr.bf16.mxu1 %v2668_v0  ;;  %v2670_v2 = vld [vmem:[#allocation5 + $0x28] sm:$0xff]   ;;  %v2671_v3 = vld [vmem:[#allocation5 + $0x20] sm:$0xff]   ;;  %v2672_v7 = vld [vmem:[#allocation5 + $0x18] sm:$0xff]  }
  0x3f   :  { %2499 = vmatpush3.bf16.msra.mxu0 %v2668_v0  ;;  %2650 = vmatpush3.bf16.msra.mxu1 %v2668_v0  ;;  %v92_v4 = vld [vmem:[#allocation2] sm:$0xff]  ;;  %v93_v5 = vld [vmem:[#allocation2 + $0x8] sm:$0xff]  ;;  %v2673_v11 = vld [vmem:[#allocation5 + $0x10] sm:$0xff]   ;;  %v3146_v57 = vshrl.u32 %v156_v56, 7 }
  0x40   :  { %2500 = vmatprep.subr.bf16.mxu0 %v2669_v1  ;;  %2643 = vmatprep.subr.bf16.mxu1 %v2669_v1  ;;  %v124_v6 = vpack.c.bf16 %v93_v5, %v92_v4  ;;  %v108_v8 = vld [vmem:[#allocation2 + $0x80] sm:$0xff]  ;;  %v109_v9 = vld [vmem:[#allocation2 + $0x88] sm:$0xff]  ;;  %v94_v14 = vld [vmem:[#allocation2 + $0x10] sm:$0xff] }
  0x41   :  { %v132_v10 = vpack.c.bf16 %v109_v9, %v108_v8  ;;  %v2674_v12 = vld [vmem:[#allocation5 + $0x8] sm:$0xff]   ;;  %v2675_v13 = vld [vmem:[#allocation5] sm:$0xff]   ;;  %v95_v15 = vld [vmem:[#allocation2 + $0x18] sm:$0xff]  ;;  %v158_v58 = vsub.s32 0, %v3146_v57 }
  0x42   :  { %2514 = vmatprep.mubr.bf16.mxu0 %v124_v6  ;;  %v96_v16 = vld [vmem:[#allocation2 + $0x20] sm:$0xff]  ;;  %v97_v17 = vld [vmem:[#allocation2 + $0x28] sm:$0xff]  ;;  %v110_v18 = vld [vmem:[#allocation2 + $0x90] sm:$0xff]  ;;  %v125_v22 = vpack.c.bf16 %v95_v15, %v94_v14 }
  0x43   :  { %2501 = vmatpush3.bf16.msra.mxu0 %v2669_v1  ;;  %2651 = vmatpush3.bf16.msra.mxu1 %v2669_v1  ;;  %v111_v19 = vld [vmem:[#allocation2 + $0x98] sm:$0xff]  ;;  %v112_v20 = vld [vmem:[#allocation2 + $0xa0] sm:$0xff]  ;;  %v113_v21 = vld [vmem:[#allocation2 + $0xa8] sm:$0xff]  ;;  %v126_v23 = vpack.c.bf16 %v97_v17, %v96_v16 }
  0x44   :  { %2502 = vmatprep.subr.bf16.mxu0 %v2670_v2  ;;  %2644 = vmatprep.subr.bf16.mxu1 %v2670_v2  ;;  %v133_v24 = vpack.c.bf16 %v111_v19, %v110_v18  ;;  %v134_v25 = vpack.c.bf16 %v113_v21, %v112_v20  ;;  %v98_v26 = vld [vmem:[#allocation2 + $0x30] sm:$0xff]  ;;  %v99_v27 = vld [vmem:[#allocation2 + $0x38] sm:$0xff]  ;;  %v100_v28 = vld [vmem:[#allocation2 + $0x40] sm:$0xff] }
  0x45   :  { %2530 = vmatprep.mubr.bf16.mxu1 %v132_v10  ;;  %v101_v29 = vld [vmem:[#allocation2 + $0x48] sm:$0xff]  ;;  %v114_v30 = vld [vmem:[#allocation2 + $0xb0] sm:$0xff]  ;;  %v115_v31 = vld [vmem:[#allocation2 + $0xb8] sm:$0xff]  ;;  %v127_v34 = vpack.c.bf16 %v99_v27, %v98_v26 }
  0x46   :  { %v116_v32 = vld [vmem:[#allocation2 + $0xc0] sm:$0xff]  ;;  %v117_v33 = vld [vmem:[#allocation2 + $0xc8] sm:$0xff]  ;;  %v128_v35 = vpack.c.bf16 %v101_v29, %v100_v28  ;;  %v135_v36 = vpack.c.bf16 %v115_v31, %v114_v30  ;;  %v102_v38 = vld [vmem:[#allocation2 + $0x50] sm:$0xff] }
  0x47   :  { %2503 = vmatpush3.bf16.msra.mxu0 %v2670_v2  ;;  %2652 = vmatpush3.bf16.msra.mxu1 %v2670_v2  ;;  %v136_v37 = vpack.c.bf16 %v117_v33, %v116_v32  ;;  %v103_v39 = vld [vmem:[#allocation2 + $0x58] sm:$0xff]  ;;  %v104_v40 = vld [vmem:[#allocation2 + $0x60] sm:$0xff]  ;;  %v105_v41 = vld [vmem:[#allocation2 + $0x68] sm:$0xff] }
  0x48   :  { %2504 = vmatprep.subr.bf16.mxu0 %v2671_v3  ;;  %2645 = vmatprep.subr.bf16.mxu1 %v2671_v3  ;;  %v118_v42 = vld [vmem:[#allocation2 + $0xd0] sm:$0xff]  ;;  %v119_v43 = vld [vmem:[#allocation2 + $0xd8] sm:$0xff]  ;;  %v120_v44 = vld [vmem:[#allocation2 + $0xe0] sm:$0xff]  ;;  %v129_v46 = vpack.c.bf16 %v103_v39, %v102_v38  ;;  %v130_v47 = vpack.c.bf16 %v105_v41, %v104_v40 }
  0x49   :  { %v121_v45 = vld [vmem:[#allocation2 + $0xe8] sm:$0xff]  ;;  %v137_v48 = vpack.c.bf16 %v119_v43, %v118_v42  ;;  %v106_v50 = vld [vmem:[#allocation2 + $0x70] sm:$0xff]  ;;  %v107_v51 = vld [vmem:[#allocation2 + $0x78] sm:$0xff] }
  0x4a   :  { %v138_v49 = vpack.c.bf16 %v121_v45, %v120_v44  ;;  %v122_v52 = vld [vmem:[#allocation2 + $0xf0] sm:$0xff]  ;;  %v123_v53 = vld [vmem:[#allocation2 + $0xf8] sm:$0xff]  ;;  %v131_v54 = vpack.c.bf16 %v107_v51, %v106_v50  ;;  %v3149_v59 = vld [vmem:[#allocation10] sm:$0xff] }
  0x4b   :  { %2505 = vmatpush3.bf16.msra.mxu0 %v2671_v3  ;;  %2653 = vmatpush3.bf16.msra.mxu1 %v2671_v3  ;;  %v139_v55 = vpack.c.bf16 %v123_v53, %v122_v52  ;;  %v3152_v60 = vrot.slane %v3149_v59, %v158_v58 }
  0x4c   :  { %2506 = vmatprep.subr.bf16.mxu0 %v2672_v7  ;;  %2646 = vmatprep.subr.bf16.mxu1 %v2672_v7 }
  0x4f   :  { %2507 = vmatpush3.bf16.msra.mxu0 %v2672_v7  ;;  %2654 = vmatpush3.bf16.msra.mxu1 %v2672_v7 }
  0x50   :  { %2508 = vmatprep.subr.bf16.mxu0 %v2673_v11  ;;  %2647 = vmatprep.subr.bf16.mxu1 %v2673_v11 }
  0x53   :  { %2509 = vmatpush3.bf16.msra.mxu0 %v2673_v11  ;;  %2655 = vmatpush3.bf16.msra.mxu1 %v2673_v11 }
  0x54   :  { %2510 = vmatprep.subr.bf16.mxu0 %v2674_v12  ;;  %2648 = vmatprep.subr.bf16.mxu1 %v2674_v12 }
  0x57   :  { %2511 = vmatpush3.bf16.msra.mxu0 %v2674_v12  ;;  %2656 = vmatpush3.bf16.msra.mxu1 %v2674_v12 }
  0x58   :  { %2512 = vmatprep.subr.bf16.mxu0 %v2675_v13  ;;  %2649 = vmatprep.subr.bf16.mxu1 %v2675_v13 }
  0x5b   :  { %2513 = vmatpush3.bf16.msra.mxu0 %v2675_v13  ;;  %2657 = vmatpush3.bf16.msra.mxu1 %v2675_v13 }
  0x5e   :  { %2515 = vmatmul.mubr.bf16.vlgmr.msra.gmra.mxu0 %v125_v22  ;;  %2531 = vmatmul.mubr.bf16.vlgmr.msra.gmra.mxu1 %v133_v24 }
  0x5f   :  { %2518 = vmatprep.mubr.bf16.mxu0 %v126_v23  ;;  %2534 = vmatprep.mubr.bf16.mxu1 %v134_v25 }
  0x66   :  { %2519 = vmatmul.mubr.bf16.gmra.mxu0 %v127_v34  ;;  %2535 = vmatmul.mubr.bf16.gmra.mxu1 %v135_v36 }
  0x67   :  { %2522 = vmatprep.mubr.bf16.mxu0 %v128_v35  ;;  %2538 = vmatprep.mubr.bf16.mxu1 %v136_v37 }
  0x6e   :  { %2523 = vmatmul.mubr.bf16.gmra.mxu0 %v129_v46  ;;  %2539 = vmatmul.mubr.bf16.gmra.mxu1 %v137_v48 }
  0x6f   :  { %2526 = vmatprep.mubr.bf16.mxu0 %v130_v47  ;;  %2542 = vmatprep.mubr.bf16.mxu1 %v138_v49 }
  0x76   :  { %2527 = vmatmul.mubr.bf16.gmra.mxu0 %v131_v54  ;;  %2543 = vmatmul.mubr.bf16.gmra.mxu1 %v139_v55 }
 0x11e   :  { %v2516_v61 = vpop.f32.mrf.mxu0  ;;  %v2532_v63 = vpop.f32.mrf.mxu1 }
 0x11f   :  { %v3155_v62 = vadd.f32 %v2516_v61, %v3152_v60  ;;  %v3223_v40 = vadd.f32 %v2532_v63, %v3152_v60 }
 0x120   :  { %v242_v0 = vpop.f32.mrf.mxu0  ;;  %v306_v3 = vpop.f32.mrf.mxu1 }
 0x121   :  { %v3158_v1 = vadd.f32 %v242_v0, %v3152_v60  ;;  %373 = vadd.xlane.f32.xlu1 %v3155_v62  ;;  %v3218_v38 = vadd.f32 %v306_v3, %v3152_v60 }
 0x122   :  { %v2517_v2 = vpop.f32.mrf.mxu0  ;;  %v2533_v8 = vpop.f32.mrf.mxu1 }
 0x123   :  { %v3162_v4 = vadd.f32 %v2517_v2, %v3152_v60  ;;  %369 = vadd.xlane.f32.xlu0 %v3158_v1  ;;  %v3231_v43 = vadd.f32 %v2533_v8, %v3152_v60 }
 0x124   :  { %v245_v5 = vpop.f32.mrf.mxu0  ;;  %v309_v12 = vpop.f32.mrf.mxu1 }
 0x125   :  { %v3166_v6 = vadd.f32 %v245_v5, %v3152_v60  ;;  %375 = vadd.xlane.f32.xlu1 %v3162_v4  ;;  %v3226_v41 = vadd.f32 %v309_v12, %v3152_v60 }
 0x126   :  { %v2520_v7 = vpop.f32.mrf.mxu0  ;;  %v2536_v17 = vpop.f32.mrf.mxu1 }
 0x127   :  { %371 = vadd.xlane.f32.xlu0 %v3166_v6  ;;  %v3175_v14 = vadd.f32 %v2520_v7, %v3152_v60  ;;  %v3239_v46 = vadd.f32 %v2536_v17, %v3152_v60 }
 0x128   :  { %v258_v9 = vpop.f32.mrf.mxu0  ;;  %v322_v22 = vpop.f32.mrf.mxu1 }
 0x129   :  { %v3171_v10 = vadd.f32 %v258_v9, %v3152_v60  ;;  %v3234_v44 = vadd.f32 %v322_v22, %v3152_v60 }
 0x12a   :  { %v2521_v11 = vpop.f32.mrf.mxu0  ;;  %v2537_v27 = vpop.f32.mrf.mxu1 }
 0x12b   :  { %377 = vadd.xlane.f32.xlu0 %v3171_v10  ;;  %v3183_v19 = vadd.f32 %v2521_v11, %v3152_v60  ;;  %v3247_v49 = vadd.f32 %v2537_v27, %v3152_v60 }
 0x12c   :  { %v261_v13 = vpop.f32.mrf.mxu0  ;;  %v325_v32 = vpop.f32.mrf.mxu1 }
 0x12d   :  { %v3178_v15 = vadd.f32 %v261_v13, %v3152_v60  ;;  %v3242_v47 = vadd.f32 %v325_v32, %v3152_v60 }
 0x12e   :  { %v2524_v16 = vpop.f32.mrf.mxu0  ;;  %v2540_v36 = vpop.f32.mrf.mxu1 }
 0x12f   :  { %379 = vadd.xlane.f32.xlu1 %v3178_v15  ;;  %381 = vadd.xlane.f32.xlu0 %v3175_v14  ;;  %v3191_v24 = vadd.f32 %v2524_v16, %v3152_v60  ;;  %v3255_v52 = vadd.f32 %v2540_v36, %v3152_v60 }
 0x130   :  { %v274_v18 = vpop.f32.mrf.mxu0  ;;  %v338_v39 = vpop.f32.mrf.mxu1 }
 0x131   :  { %v3186_v20 = vadd.f32 %v274_v18, %v3152_v60  ;;  %v3250_v50 = vadd.f32 %v338_v39, %v3152_v60 }
 0x132   :  { %v2525_v21 = vpop.f32.mrf.mxu0  ;;  %v2541_v42 = vpop.f32.mrf.mxu1 }
 0x133   :  { %383 = vadd.xlane.f32.xlu1 %v3183_v19  ;;  %385 = vadd.xlane.f32.xlu0 %v3186_v20  ;;  %v3199_v29 = vadd.f32 %v2525_v21, %v3152_v60  ;;  %v3263_v55 = vadd.f32 %v2541_v42, %v3152_v60 }
 0x134   :  { %v277_v23 = vpop.f32.mrf.mxu0  ;;  %v341_v45 = vpop.f32.mrf.mxu1 }
 0x135   :  { %v3194_v25 = vadd.f32 %v277_v23, %v3152_v60  ;;  %v3258_v53 = vadd.f32 %v341_v45, %v3152_v60 }
 0x136   :  { %v2528_v26 = vpop.f32.mrf.mxu0  ;;  %v2544_v48 = vpop.f32.mrf.mxu1 }
 0x137   :  { %387 = vadd.xlane.f32.xlu1 %v3194_v25  ;;  %389 = vadd.xlane.f32.xlu0 %v3191_v24  ;;  %v3207_v34 = vadd.f32 %v2528_v26, %v3152_v60  ;;  %v3271_v61 = vadd.f32 %v2544_v48, %v3152_v60 }
 0x138   :  { %v290_v28 = vpop.f32.mrf.mxu0  ;;  %v354_v51 = vpop.f32.mrf.mxu1 }
 0x139   :  { %v3202_v30 = vadd.f32 %v290_v28, %v3152_v60  ;;  %v3266_v56 = vadd.f32 %v354_v51, %v3152_v60 }
 0x13a   :  { %v2529_v31 = vpop.f32.mrf.mxu0  ;;  %v2545_v54 = vpop.f32.mrf.mxu1 }
 0x13b   :  { %391 = vadd.xlane.f32.xlu1 %v3199_v29  ;;  %393 = vadd.xlane.f32.xlu0 %v3202_v30  ;;  %v3215_v37 = vadd.f32 %v2529_v31, %v3152_v60  ;;  %v3279_v0 = vadd.f32 %v2545_v54, %v3152_v60 }
 0x13c   :  { %v293_v33 = vpop.f32.mrf.mxu0  ;;  %v357_v58 = vpop.f32.mrf.mxu1 }
 0x13d   :  { %v3210_v35 = vadd.f32 %v293_v33, %v3152_v60  ;;  %v3274_v63 = vadd.f32 %v357_v58, %v3152_v60 }
 0x13f   :  { %395 = vadd.xlane.f32.xlu1 %v3210_v35  ;;  %397 = vadd.xlane.f32.xlu0 %v3207_v34 }
 0x143   :  { %399 = vadd.xlane.f32.xlu1 %v3215_v37  ;;  %401 = vadd.xlane.f32.xlu0 %v3218_v38 }
 0x147   :  { %403 = vadd.xlane.f32.xlu1 %v3226_v41  ;;  %405 = vadd.xlane.f32.xlu0 %v3223_v40 }
 0x14b   :  { %407 = vadd.xlane.f32.xlu1 %v3231_v43  ;;  %409 = vadd.xlane.f32.xlu0 %v3234_v44 }
 0x14f   :  { %411 = vadd.xlane.f32.xlu1 %v3242_v47  ;;  %413 = vadd.xlane.f32.xlu0 %v3239_v46 }
 0x153   :  { %415 = vadd.xlane.f32.xlu1 %v3247_v49  ;;  %417 = vadd.xlane.f32.xlu0 %v3250_v50 }
 0x157   :  { %419 = vadd.xlane.f32.xlu1 %v3258_v53  ;;  %421 = vadd.xlane.f32.xlu0 %v3255_v52 }
 0x15b   :  { %423 = vadd.xlane.f32.xlu1 %v3263_v55  ;;  %425 = vadd.xlane.f32.xlu0 %v3266_v56 }
 0x15f   :  { %427 = vadd.xlane.f32.xlu1 %v3274_v63  ;;  %429 = vadd.xlane.f32.xlu0 %v3271_v61 }
 0x163   :  { %431 = vadd.xlane.f32.xlu1 %v3279_v0 }
 0x1aa   :  { %v374_v2 = vpop.xlane.xlu1 %373 }
 0x1ab   :  { %v436_v5 = vmul.f32 0.0078125, %v374_v2 }
 0x1ac   :  { %v370_v3 = vpop.xlane.xlu0 %369 }
 0x1ad   :  { %v434_v7 = vmul.f32 0.0078125, %v370_v3  ;;  %v3288_v17 = vsub.f32 %v3155_v62, %v436_v5 }
 0x1ae   :  { %v376_v8 = vpop.xlane.xlu1 %375 }
 0x1af   :  { %v3283_v9 = vsub.f32 %v3158_v1, %v434_v7  ;;  %v437_v12 = vmul.f32 0.0078125, %v376_v8  ;;  %v500_v22 = vmul.f32 %v3288_v17, %v3288_v17 }
 0x1b0   :  { %v372_v11 = vpop.xlane.xlu0 %371 }
 0x1b1   :  { %v435_v13 = vmul.f32 0.0078125, %v372_v11  ;;  %v498_v16 = vmul.f32 %v3283_v9, %v3283_v9  ;;  %v3298_v23 = vsub.f32 %v3162_v4, %v437_v12  ;;  %v2677_v12 = vld [vmem:[#allocation7 + $0x30] sm:$0xff]  }
 0x1b3   :  { %530 = vadd.xlane.f32.xlu0 %v498_v16  ;;  %v3291_v60 = vsub.f32 %v3166_v6, %v435_v13  ;;  %v501_v31 = vmul.f32 %v3298_v23, %v3298_v23 }
 0x1b4   :  { %v378_v18 = vpop.xlane.xlu0 %377 }
 0x1b5   :  { %v438_v21 = vmul.f32 0.0078125, %v378_v18  ;;  %v499_v1 = vmul.f32 %v3291_v60, %v3291_v60 }
 0x1b7   :  { %534 = vadd.xlane.f32.xlu0 %v500_v22  ;;  %532 = vadd.xlane.f32.xlu1 %v499_v1  ;;  %v3301_v62 = vsub.f32 %v3171_v10, %v438_v21 }
 0x1b8   :  { %v380_v26 = vpop.xlane.xlu1 %379  ;;  %v382_v27 = vpop.xlane.xlu0 %381 }
 0x1b9   :  { %v439_v6 = vmul.f32 0.0078125, %v380_v26  ;;  %v440_v28 = vmul.f32 0.0078125, %v382_v27  ;;  %v502_v32 = vmul.f32 %v3301_v62, %v3301_v62  ;;  %v2678_v26 = vld [vmem:[#allocation7 + $0x28] sm:$0xff]  }
 0x1bb   :  { %536 = vadd.xlane.f32.xlu1 %v501_v31  ;;  %538 = vadd.xlane.f32.xlu0 %v502_v32  ;;  %v3308_v4 = vsub.f32 %v3178_v15, %v439_v6  ;;  %v3311_v33 = vsub.f32 %v3175_v14, %v440_v28  ;;  %v2676_v14 = vld [vmem:[#allocation7 + $0x38] sm:$0xff]  }
 0x1bc   :  { %v384_v10 = vpop.xlane.xlu1 %383  ;;  %v386_v36 = vpop.xlane.xlu0 %385  ;;  %2546 = vmatprep.subr.bf16.mxu1 %v2676_v14 }
 0x1bd   :  { %v441_v39 = vmul.f32 0.0078125, %v384_v10  ;;  %v442_v42 = vmul.f32 0.0078125, %v386_v36  ;;  %v503_v45 = vmul.f32 %v3308_v4, %v3308_v4  ;;  %v504_v48 = vmul.f32 %v3311_v33, %v3311_v33  ;;  %2547 = vmatpush3.bf16.msra.mxu1 %v2676_v14  ;;  %v2679_v36 = vld [vmem:[#allocation7 + $0x20] sm:$0xff]  }
 0x1be   :  { %2548 = vmatprep.subr.bf16.mxu1 %v2677_v12 }
 0x1bf   :  { %540 = vadd.xlane.f32.xlu1 %v503_v45  ;;  %542 = vadd.xlane.f32.xlu0 %v504_v48  ;;  %v3318_v51 = vsub.f32 %v3183_v19, %v441_v39  ;;  %v3321_v15 = vsub.f32 %v3186_v20, %v442_v42 }
 0x1c0   :  { %v388_v54 = vpop.xlane.xlu1 %387  ;;  %v390_v58 = vpop.xlane.xlu0 %389 }
 0x1c1   :  { %v443_v2 = vmul.f32 0.0078125, %v388_v54  ;;  %v444_v3 = vmul.f32 0.0078125, %v390_v58  ;;  %v505_v5 = vmul.f32 %v3318_v51, %v3318_v51  ;;  %v506_v7 = vmul.f32 %v3321_v15, %v3321_v15  ;;  %2549 = vmatpush3.bf16.msra.mxu1 %v2677_v12  ;;  %v2680_v58 = vld [vmem:[#allocation7 + $0x18] sm:$0xff]   ;;  %v2681_v12 = vld [vmem:[#allocation7 + $0x10] sm:$0xff]  }
 0x1c2   :  { %2550 = vmatprep.subr.bf16.mxu1 %v2678_v26 }
 0x1c3   :  { %544 = vadd.xlane.f32.xlu1 %v505_v5  ;;  %546 = vadd.xlane.f32.xlu0 %v506_v7  ;;  %v3328_v19 = vsub.f32 %v3194_v25, %v443_v2  ;;  %v3331_v20 = vsub.f32 %v3191_v24, %v444_v3 }
 0x1c4   :  { %v392_v8 = vpop.xlane.xlu1 %391  ;;  %v394_v11 = vpop.xlane.xlu0 %393 }
 0x1c5   :  { %v445_v13 = vmul.f32 0.0078125, %v392_v8  ;;  %v446_v16 = vmul.f32 0.0078125, %v394_v11  ;;  %v507_v18 = vmul.f32 %v3328_v19, %v3328_v19  ;;  %v508_v21 = vmul.f32 %v3331_v20, %v3331_v20  ;;  %2551 = vmatpush3.bf16.msra.mxu1 %v2678_v26  ;;  %v2682_v26 = vld [vmem:[#allocation7 + $0x8] sm:$0xff]  }
 0x1c6   :  { %2552 = vmatprep.subr.bf16.mxu1 %v2679_v36 }
 0x1c7   :  { %548 = vadd.xlane.f32.xlu1 %v507_v18  ;;  %550 = vadd.xlane.f32.xlu0 %v508_v21  ;;  %v3338_v25 = vsub.f32 %v3199_v29, %v445_v13  ;;  %v3341_v24 = vsub.f32 %v3202_v30, %v446_v16 }
 0x1c8   :  { %v396_v22 = vpop.xlane.xlu1 %395  ;;  %v398_v1 = vpop.xlane.xlu0 %397 }
 0x1c9   :  { %v447_v27 = vmul.f32 0.0078125, %v396_v22  ;;  %v448_v6 = vmul.f32 0.0078125, %v398_v1  ;;  %v509_v28 = vmul.f32 %v3338_v25, %v3338_v25  ;;  %v510_v31 = vmul.f32 %v3341_v24, %v3341_v24  ;;  %2553 = vmatpush3.bf16.msra.mxu1 %v2679_v36  ;;  %v2683_v36 = vld [vmem:[#allocation7] sm:$0xff]  }
 0x1ca   :  { %2554 = vmatprep.subr.bf16.mxu1 %v2680_v58 }
 0x1cb   :  { %552 = vadd.xlane.f32.xlu1 %v509_v28  ;;  %554 = vadd.xlane.f32.xlu0 %v510_v31  ;;  %v3348_v29 = vsub.f32 %v3210_v35, %v447_v27  ;;  %v3351_v30 = vsub.f32 %v3207_v34, %v448_v6 }
 0x1cc   :  { %v400_v32 = vpop.xlane.xlu1 %399  ;;  %v402_v10 = vpop.xlane.xlu0 %401 }
 0x1cd   :  { %v449_v39 = vmul.f32 0.0078125, %v400_v32  ;;  %v450_v42 = vmul.f32 0.0078125, %v402_v10  ;;  %v511_v45 = vmul.f32 %v3348_v29, %v3348_v29  ;;  %v512_v48 = vmul.f32 %v3351_v30, %v3351_v30  ;;  %2555 = vmatpush3.bf16.msra.mxu1 %v2680_v58 }
 0x1ce   :  { %2556 = vmatprep.subr.bf16.mxu1 %v2681_v12 }
 0x1cf   :  { %556 = vadd.xlane.f32.xlu1 %v511_v45  ;;  %558 = vadd.xlane.f32.xlu0 %v512_v48  ;;  %v3358_v35 = vsub.f32 %v3215_v37, %v449_v39  ;;  %v3361_v34 = vsub.f32 %v3218_v38, %v450_v42 }
 0x1d0   :  { %v404_v14 = vpop.xlane.xlu1 %403  ;;  %v406_v54 = vpop.xlane.xlu0 %405 }
 0x1d1   :  { %v451_v2 = vmul.f32 0.0078125, %v404_v14  ;;  %v452_v3 = vmul.f32 0.0078125, %v406_v54  ;;  %v513_v5 = vmul.f32 %v3358_v35, %v3358_v35  ;;  %v514_v7 = vmul.f32 %v3361_v34, %v3361_v34  ;;  %2557 = vmatpush3.bf16.msra.mxu1 %v2681_v12 }
 0x1d2   :  { %2558 = vmatprep.subr.bf16.mxu1 %v2682_v26 }
 0x1d3   :  { %560 = vadd.xlane.f32.xlu1 %v513_v5  ;;  %562 = vadd.xlane.f32.xlu0 %v514_v7  ;;  %v3368_v37 = vsub.f32 %v3226_v41, %v451_v2  ;;  %v3371_v38 = vsub.f32 %v3223_v40, %v452_v3 }
 0x1d4   :  { %v408_v8 = vpop.xlane.xlu1 %407  ;;  %v410_v11 = vpop.xlane.xlu0 %409 }
 0x1d5   :  { %v453_v13 = vmul.f32 0.0078125, %v408_v8  ;;  %v454_v16 = vmul.f32 0.0078125, %v410_v11  ;;  %v515_v18 = vmul.f32 %v3368_v37, %v3368_v37  ;;  %v516_v21 = vmul.f32 %v3371_v38, %v3371_v38  ;;  %2559 = vmatpush3.bf16.msra.mxu1 %v2682_v26 }
 0x1d6   :  { %2560 = vmatprep.subr.bf16.mxu1 %v2683_v36 }
 0x1d7   :  { %564 = vadd.xlane.f32.xlu1 %v515_v18  ;;  %566 = vadd.xlane.f32.xlu0 %v516_v21  ;;  %v3378_v41 = vsub.f32 %v3231_v43, %v453_v13  ;;  %v3381_v40 = vsub.f32 %v3234_v44, %v454_v16 }
 0x1d8   :  { %v412_v22 = vpop.xlane.xlu1 %411  ;;  %v414_v1 = vpop.xlane.xlu0 %413 }
 0x1d9   :  { %v455_v27 = vmul.f32 0.0078125, %v412_v22  ;;  %v456_v6 = vmul.f32 0.0078125, %v414_v1  ;;  %v517_v28 = vmul.f32 %v3378_v41, %v3378_v41  ;;  %v518_v31 = vmul.f32 %v3381_v40, %v3381_v40  ;;  %2561 = vmatpush3.bf16.msra.mxu1 %v2683_v36 }
 0x1db   :  { %568 = vadd.xlane.f32.xlu1 %v517_v28  ;;  %570 = vadd.xlane.f32.xlu0 %v518_v31  ;;  %v3388_v43 = vsub.f32 %v3242_v47, %v455_v27  ;;  %v3391_v44 = vsub.f32 %v3239_v46, %v456_v6 }
 0x1dc   :  { %v416_v32 = vpop.xlane.xlu1 %415  ;;  %v418_v10 = vpop.xlane.xlu0 %417 }
 0x1dd   :  { %v457_v39 = vmul.f32 0.0078125, %v416_v32  ;;  %v458_v42 = vmul.f32 0.0078125, %v418_v10  ;;  %v519_v45 = vmul.f32 %v3388_v43, %v3388_v43  ;;  %v520_v48 = vmul.f32 %v3391_v44, %v3391_v44 }
 0x1df   :  { %572 = vadd.xlane.f32.xlu1 %v519_v45  ;;  %574 = vadd.xlane.f32.xlu0 %v520_v48  ;;  %v3398_v47 = vsub.f32 %v3247_v49, %v457_v39  ;;  %v3401_v46 = vsub.f32 %v3250_v50, %v458_v42 }
 0x1e0   :  { %v420_v14 = vpop.xlane.xlu1 %419  ;;  %v422_v54 = vpop.xlane.xlu0 %421 }
 0x1e1   :  { %v459_v58 = vmul.f32 0.0078125, %v420_v14  ;;  %v460_v2 = vmul.f32 0.0078125, %v422_v54  ;;  %v521_v3 = vmul.f32 %v3398_v47, %v3398_v47  ;;  %v522_v5 = vmul.f32 %v3401_v46, %v3401_v46 }
 0x1e3   :  { %576 = vadd.xlane.f32.xlu1 %v521_v3  ;;  %578 = vadd.xlane.f32.xlu0 %v522_v5  ;;  %v3408_v7 = vsub.f32 %v3258_v53, %v459_v58  ;;  %v3411_v49 = vsub.f32 %v3255_v52, %v460_v2 }
 0x1e4   :  { %v424_v50 = vpop.xlane.xlu1 %423  ;;  %v426_v8 = vpop.xlane.xlu0 %425 }
 0x1e5   :  { %v461_v11 = vmul.f32 0.0078125, %v424_v50  ;;  %v462_v12 = vmul.f32 0.0078125, %v426_v8  ;;  %v523_v13 = vmul.f32 %v3408_v7, %v3408_v7  ;;  %v524_v16 = vmul.f32 %v3411_v49, %v3411_v49 }
 0x1e7   :  { %580 = vadd.xlane.f32.xlu1 %v523_v13  ;;  %582 = vadd.xlane.f32.xlu0 %v524_v16  ;;  %v3418_v18 = vsub.f32 %v3263_v55, %v461_v11  ;;  %v3421_v53 = vsub.f32 %v3266_v56, %v462_v12 }
 0x1e8   :  { %v428_v52 = vpop.xlane.xlu1 %427  ;;  %v430_v21 = vpop.xlane.xlu0 %429 }
 0x1e9   :  { %v463_v22 = vmul.f32 0.0078125, %v428_v52  ;;  %v464_v1 = vmul.f32 0.0078125, %v430_v21  ;;  %v525_v26 = vmul.f32 %v3418_v18, %v3418_v18  ;;  %v526_v27 = vmul.f32 %v3421_v53, %v3421_v53 }
 0x1ea   :  { %v724_v52 = vsub.s32 1, %v3146_v57 }
 0x1eb   :  { %584 = vadd.xlane.f32.xlu1 %v525_v26  ;;  %586 = vadd.xlane.f32.xlu0 %v526_v27  ;;  %v3428_v6 = vsub.f32 %v3274_v63, %v463_v22  ;;  %v3431_v55 = vsub.f32 %v3271_v61, %v464_v1  ;;  %v760_v27 = vsub.s32 2, %v3146_v57 }
 0x1ec   :  { %v432_v56 = vpop.xlane.xlu1 %431 }
 0x1ed   :  { %v465_v28 = vmul.f32 0.0078125, %v432_v56  ;;  %v527_v31 = vmul.f32 %v3428_v6, %v3428_v6  ;;  %v528_v32 = vmul.f32 %v3431_v55, %v3431_v55 }
 0x1ef   :  { %588 = vadd.xlane.f32.xlu1 %v527_v31  ;;  %590 = vadd.xlane.f32.xlu0 %v528_v32  ;;  %v3438_v10 = vsub.f32 %v3279_v0, %v465_v28  ;;  %v3445_v31 = vrot.slane %v3149_v59, %v724_v52 }
 0x1f1   :  { %v529_v63 = vmul.f32 %v3438_v10, %v3438_v10 }
 0x1f3   :  { %592 = vadd.xlane.f32.xlu1 %v529_v63 }
 0x23c   :  { %v531_v36 = vpop.xlane.xlu0 %530 }
 0x23d   :  { %v594_v61 = vmul.f32 0.0078125, %v531_v36 }
 0x23f   :  { %v626_v39 = vadd.f32 1e-05, %v594_v61 }
 0x240   :  { %v533_v42 = vpop.xlane.xlu1 %532  ;;  %v535_v45 = vpop.xlane.xlu0 %534 }
 0x241   :  { %2692 = vrsqrt.f32 %v626_v39  ;;  %v595_v48 = vmul.f32 0.0078125, %v533_v42  ;;  %v596_v14 = vmul.f32 0.0078125, %v535_v45  ;;  %v3449_v45 = vrot.slane %v3149_v59, %v760_v27 }
 0x243   :  { %v627_v54 = vadd.f32 1e-05, %v595_v48  ;;  %v628_v58 = vadd.f32 1e-05, %v596_v14 }
 0x244   :  { %v537_v2 = vpop.xlane.xlu1 %536  ;;  %v539_v3 = vpop.xlane.xlu0 %538 }
 0x245   :  { %2694 = vrsqrt.f32 %v627_v54  ;;  %v597_v5 = vmul.f32 0.0078125, %v537_v2  ;;  %v598_v0 = vmul.f32 0.0078125, %v539_v3 }
 0x246   :  { %2696 = vrsqrt.f32 %v628_v58 }
 0x247   :  { %v629_v50 = vadd.f32 1e-05, %v597_v5  ;;  %v630_v8 = vadd.f32 1e-05, %v598_v0 }
 0x248   :  { %v541_v11 = vpop.xlane.xlu1 %540  ;;  %v543_v12 = vpop.xlane.xlu0 %542 }
 0x249   :  { %2698 = vrsqrt.f32 %v629_v50  ;;  %v599_v13 = vmul.f32 0.0078125, %v541_v11  ;;  %v600_v16 = vmul.f32 0.0078125, %v543_v12 }
 0x24a   :  { %2700 = vrsqrt.f32 %v630_v8 }
 0x24b   :  { %v631_v21 = vadd.f32 1e-05, %v599_v13  ;;  %v632_v22 = vadd.f32 1e-05, %v600_v16 }
 0x24c   :  { %v545_v1 = vpop.xlane.xlu1 %544  ;;  %v547_v26 = vpop.xlane.xlu0 %546 }
 0x24d   :  { %2702 = vrsqrt.f32 %v631_v21  ;;  %v601_v56 = vmul.f32 0.0078125, %v545_v1  ;;  %v602_v28 = vmul.f32 0.0078125, %v547_v26 }
 0x24e   :  { %v2693_v32 = vpop.eup %2692  ;;  %2704 = vrsqrt.f32 %v632_v22 }
 0x24f   :  { %v633_v63 = vadd.f32 1e-05, %v601_v56  ;;  %v634_v36 = vadd.f32 1e-05, %v602_v28  ;;  %v690_v61 = vmul.f32 %v2693_v32, %v3283_v9 }
 0x250   :  { %v549_v39 = vpop.xlane.xlu1 %548  ;;  %v551_v42 = vpop.xlane.xlu0 %550 }
 0x251   :  { %2706 = vrsqrt.f32 %v633_v63  ;;  %v603_v48 = vmul.f32 0.0078125, %v549_v39  ;;  %v604_v14 = vmul.f32 0.0078125, %v551_v42  ;;  %v726_v54 = vmul.f32 %v3445_v31, %v690_v61 }
 0x252   :  { %v2695_v58 = vpop.eup %2694  ;;  %2708 = vrsqrt.f32 %v634_v36 }
 0x253   :  { %v2697_v2 = vpop.eup %2696  ;;  %v635_v3 = vadd.f32 1e-05, %v603_v48  ;;  %v636_v5 = vadd.f32 1e-05, %v604_v14  ;;  %v691_v0 = vmul.f32 %v2695_v58, %v3291_v60  ;;  %v762_v11 = vadd.f32 %v3449_v45, %v726_v54 }
 0x254   :  { %v692_v50 = vmul.f32 %v2697_v2, %v3288_v17  ;;  %v553_v9 = vpop.xlane.xlu1 %552  ;;  %v555_v8 = vpop.xlane.xlu0 %554 }
 0x255   :  { %2710 = vrsqrt.f32 %v635_v3  ;;  %v605_v59 = vmul.f32 0.0078125, %v553_v9  ;;  %v606_v12 = vmul.f32 0.0078125, %v555_v8  ;;  %v727_v13 = vmul.f32 %v3445_v31, %v691_v0 }
 0x256   :  { %v2699_v16 = vpop.eup %2698  ;;  %2712 = vrsqrt.f32 %v636_v5  ;;  %v728_v52 = vmul.f32 %v3445_v31, %v692_v50  ;;  %v794_v56 = vmax.f32 %v762_v11, 0.0 }
 0x257   :  { %v2701_v21 = vpop.eup %2700  ;;  %v693_v22 = vmul.f32 %v2699_v16, %v3298_v23  ;;  %v637_v1 = vadd.f32 1e-05, %v605_v59  ;;  %v638_v60 = vadd.f32 1e-05, %v606_v12  ;;  %v763_v17 = vadd.f32 %v3449_v45, %v727_v13 }
 0x258   :  { %v557_v26 = vpop.xlane.xlu1 %556  ;;  %v559_v27 = vpop.xlane.xlu0 %558  ;;  %v694_v28 = vmul.f32 %v2701_v21, %v3301_v62  ;;  %v764_v42 = vadd.f32 %v3449_v45, %v728_v52 }
 0x259   :  { %2714 = vrsqrt.f32 %v637_v1  ;;  %v607_v32 = vmul.f32 0.0078125, %v557_v26  ;;  %v608_v63 = vmul.f32 0.0078125, %v559_v27  ;;  %v795_v36 = vmax.f32 %v763_v17, 0.0 }
 0x25a   :  { %v2703_v61 = vpop.eup %2702  ;;  %2716 = vrsqrt.f32 %v638_v60  ;;  %v729_v39 = vmul.f32 %v3445_v31, %v693_v22  ;;  %v730_v23 = vmul.f32 %v3445_v31, %v694_v28  ;;  %v796_v12 = vmax.f32 %v764_v42, 0.0 }
 0x25b   :  { %v2705_v48 = vpop.eup %2704  ;;  %v639_v14 = vadd.f32 1e-05, %v607_v32  ;;  %v640_v54 = vadd.f32 1e-05, %v608_v63  ;;  %v826_v58 = vpack.c.bf16 %v795_v36, %v794_v56  ;;  %v695_v2 = vmul.f32 %v2703_v61, %v3308_v4 }
 0x25c   :  { %v561_v3 = vpop.xlane.xlu1 %560  ;;  %v563_v62 = vpop.xlane.xlu0 %562  ;;  %v765_v5 = vadd.f32 %v3449_v45, %v729_v39  ;;  %v766_v0 = vadd.f32 %v3449_v45, %v730_v23  ;;  %v696_v50 = vmul.f32 %v2705_v48, %v3311_v33 }
 0x25d   :  { %2718 = vrsqrt.f32 %v639_v14  ;;  %v609_v9 = vmul.f32 0.0078125, %v561_v3  ;;  %v610_v8 = vmul.f32 0.0078125, %v563_v62  ;;  %2562 = vmatprep.mubr.bf16.mxu1 %v826_v58  ;;  %v731_v11 = vmul.f32 %v3445_v31, %v695_v2 }
 0x25e   :  { %v2707_v59 = vpop.eup %2706  ;;  %2720 = vrsqrt.f32 %v640_v54  ;;  %v797_v13 = vmax.f32 %v765_v5, 0.0  ;;  %v732_v4 = vmul.f32 %v3445_v31, %v696_v50  ;;  %v798_v26 = vmax.f32 %v766_v0, 0.0 }
 0x25f   :  { %v2709_v16 = vpop.eup %2708  ;;  %v641_v52 = vadd.f32 1e-05, %v609_v9  ;;  %v642_v21 = vadd.f32 1e-05, %v610_v8  ;;  %v767_v22 = vadd.f32 %v3449_v45, %v731_v11  ;;  %v697_v1 = vmul.f32 %v2707_v59, %v3318_v51 }
 0x260   :  { %v565_v33 = vpop.xlane.xlu1 %564  ;;  %v567_v60 = vpop.xlane.xlu0 %566  ;;  %v827_v17 = vpack.c.bf16 %v797_v13, %v796_v12  ;;  %v698_v27 = vmul.f32 %v2709_v16, %v3321_v15  ;;  %v768_v61 = vadd.f32 %v3449_v45, %v732_v4 }
 0x261   :  { %2722 = vrsqrt.f32 %v641_v52  ;;  %v611_v56 = vmul.f32 0.0078125, %v565_v33  ;;  %v612_v28 = vmul.f32 0.0078125, %v567_v60  ;;  %v799_v32 = vmax.f32 %v767_v22, 0.0 }
 0x262   :  { %v2711_v63 = vpop.eup %2710  ;;  %2724 = vrsqrt.f32 %v642_v21  ;;  %2563 = vmatmul.mubr.bf16.vlgmr.msra.gmra.mxu1 %v827_v17  ;;  %v733_v36 = vmul.f32 %v3445_v31, %v697_v1  ;;  %v734_v39 = vmul.f32 %v3445_v31, %v698_v27  ;;  %v800_v9 = vmax.f32 %v768_v61, 0.0 }
 0x263   :  { %v2713_v51 = vpop.eup %2712  ;;  %v643_v42 = vadd.f32 1e-05, %v611_v56  ;;  %v644_v23 = vadd.f32 1e-05, %v612_v28  ;;  %v828_v48 = vpack.c.bf16 %v799_v32, %v798_v26  ;;  %v699_v14 = vmul.f32 %v2711_v63, %v3328_v19 }
 0x264   :  { %v569_v15 = vpop.xlane.xlu1 %568  ;;  %v571_v54 = vpop.xlane.xlu0 %570  ;;  %v769_v58 = vadd.f32 %v3449_v45, %v733_v36  ;;  %v770_v2 = vadd.f32 %v3449_v45, %v734_v39  ;;  %v700_v3 = vmul.f32 %v2713_v51, %v3331_v20 }
 0x265   :  { %2726 = vrsqrt.f32 %v643_v42  ;;  %v613_v62 = vmul.f32 0.0078125, %v569_v15  ;;  %v614_v5 = vmul.f32 0.0078125, %v571_v54  ;;  %2566 = vmatprep.mubr.bf16.mxu1 %v828_v48  ;;  %v735_v0 = vmul.f32 %v3445_v31, %v699_v14 }
 0x266   :  { %v2715_v50 = vpop.eup %2714  ;;  %2728 = vrsqrt.f32 %v644_v23  ;;  %v801_v8 = vmax.f32 %v769_v58, 0.0  ;;  %v736_v19 = vmul.f32 %v3445_v31, %v700_v3  ;;  %v802_v21 = vmax.f32 %v770_v2, 0.0 }
 0x267   :  { %v2717_v11 = vpop.eup %2716  ;;  %v645_v59 = vadd.f32 1e-05, %v613_v62  ;;  %v646_v12 = vadd.f32 1e-05, %v614_v5  ;;  %v771_v13 = vadd.f32 %v3449_v45, %v735_v0  ;;  %v701_v4 = vmul.f32 %v2715_v50, %v3338_v25 }
 0x268   :  { %v573_v20 = vpop.xlane.xlu1 %572  ;;  %v575_v16 = vpop.xlane.xlu0 %574  ;;  %v829_v52 = vpack.c.bf16 %v801_v8, %v800_v9  ;;  %v702_v22 = vmul.f32 %v2717_v11, %v3341_v24  ;;  %v772_v27 = vadd.f32 %v3449_v45, %v736_v19 }
 0x269   :  { %2730 = vrsqrt.f32 %v645_v59  ;;  %v615_v1 = vmul.f32 0.0078125, %v573_v20  ;;  %v616_v33 = vmul.f32 0.0078125, %v575_v16  ;;  %v803_v60 = vmax.f32 %v771_v13, 0.0 }
 0x26a   :  { %v2719_v17 = vpop.eup %2718  ;;  %2732 = vrsqrt.f32 %v646_v12  ;;  %2567 = vmatmul.mubr.bf16.gmra.mxu1 %v829_v52  ;;  %v737_v26 = vmul.f32 %v3445_v31, %v701_v4  ;;  %v738_v56 = vmul.f32 %v3445_v31, %v702_v22  ;;  %v804_v54 = vmax.f32 %v772_v27, 0.0 }
 0x26b   :  { %v2721_v25 = vpop.eup %2720  ;;  %v647_v28 = vadd.f32 1e-05, %v615_v1  ;;  %v648_v32 = vadd.f32 1e-05, %v616_v33  ;;  %v830_v63 = vpack.c.bf16 %v803_v60, %v802_v21  ;;  %v703_v36 = vmul.f32 %v2719_v17, %v3348_v29 }
 0x26c   :  { %v577_v24 = vpop.xlane.xlu1 %576  ;;  %v579_v61 = vpop.xlane.xlu0 %578  ;;  %v773_v39 = vadd.f32 %v3449_v45, %v737_v26  ;;  %v774_v51 = vadd.f32 %v3449_v45, %v738_v56  ;;  %v704_v42 = vmul.f32 %v2721_v25, %v3351_v30 }
 0x26d   :  { %2734 = vrsqrt.f32 %v647_v28  ;;  %v617_v23 = vmul.f32 0.0078125, %v577_v24  ;;  %v618_v48 = vmul.f32 0.0078125, %v579_v61  ;;  %2570 = vmatprep.mubr.bf16.mxu1 %v830_v63  ;;  %v739_v14 = vmul.f32 %v3445_v31, %v703_v36 }
 0x26e   :  { %v2723_v15 = vpop.eup %2722  ;;  %2736 = vrsqrt.f32 %v648_v32  ;;  %v805_v58 = vmax.f32 %v773_v39, 0.0  ;;  %v740_v29 = vmul.f32 %v3445_v31, %v704_v42  ;;  %v806_v8 = vmax.f32 %v774_v51, 0.0 }
 0x26f   :  { %v2725_v2 = vpop.eup %2724  ;;  %v649_v3 = vadd.f32 1e-05, %v617_v23  ;;  %v650_v62 = vadd.f32 1e-05, %v618_v48  ;;  %v775_v5 = vadd.f32 %v3449_v45, %v739_v14  ;;  %v705_v0 = vmul.f32 %v2723_v15, %v3358_v35 }
 0x270   :  { %v581_v30 = vpop.xlane.xlu1 %580  ;;  %v583_v50 = vpop.xlane.xlu0 %582  ;;  %v831_v9 = vpack.c.bf16 %v805_v58, %v804_v54  ;;  %v706_v19 = vmul.f32 %v2725_v2, %v3361_v34  ;;  %v776_v20 = vadd.f32 %v3449_v45, %v740_v29 }
 0x271   :  { %2738 = vrsqrt.f32 %v649_v3  ;;  %v619_v11 = vmul.f32 0.0078125, %v581_v30  ;;  %v620_v59 = vmul.f32 0.0078125, %v583_v50  ;;  %v807_v12 = vmax.f32 %v775_v5, 0.0 }
 0x272   :  { %v2727_v13 = vpop.eup %2726  ;;  %2740 = vrsqrt.f32 %v650_v62  ;;  %2571 = vmatmul.mubr.bf16.gmra.mxu1 %v831_v9  ;;  %v741_v4 = vmul.f32 %v3445_v31, %v705_v0  ;;  %v742_v16 = vmul.f32 %v3445_v31, %v706_v19  ;;  %v808_v32 = vmax.f32 %v776_v20, 0.0 }
 0x273   :  { %v2729_v35 = vpop.eup %2728  ;;  %v651_v52 = vadd.f32 1e-05, %v619_v11  ;;  %v652_v21 = vadd.f32 1e-05, %v620_v59  ;;  %v832_v22 = vpack.c.bf16 %v807_v12, %v806_v8  ;;  %v707_v1 = vmul.f32 %v2727_v13, %v3368_v37 }
 0x274   :  { %v585_v34 = vpop.xlane.xlu1 %584  ;;  %v587_v33 = vpop.xlane.xlu0 %586  ;;  %v777_v60 = vadd.f32 %v3449_v45, %v741_v4  ;;  %v778_v17 = vadd.f32 %v3449_v45, %v742_v16  ;;  %v708_v26 = vmul.f32 %v2729_v35, %v3371_v38 }
 0x275   :  { %2742 = vrsqrt.f32 %v651_v52  ;;  %v621_v27 = vmul.f32 0.0078125, %v585_v34  ;;  %v622_v56 = vmul.f32 0.0078125, %v587_v33  ;;  %2574 = vmatprep.mubr.bf16.mxu1 %v832_v22  ;;  %v743_v25 = vmul.f32 %v3445_v31, %v707_v1 }
 0x276   :  { %v2731_v28 = vpop.eup %2730  ;;  %2744 = vrsqrt.f32 %v652_v21  ;;  %v809_v63 = vmax.f32 %v777_v60, 0.0  ;;  %v744_v37 = vmul.f32 %v3445_v31, %v708_v26  ;;  %v810_v48 = vmax.f32 %v778_v17, 0.0 }
 0x277   :  { %v2733_v36 = vpop.eup %2732  ;;  %v653_v24 = vadd.f32 1e-05, %v621_v27  ;;  %v654_v61 = vadd.f32 1e-05, %v622_v56  ;;  %v779_v39 = vadd.f32 %v3449_v45, %v743_v25  ;;  %v709_v51 = vmul.f32 %v2731_v28, %v3378_v41 }
 0x278   :  { %v589_v38 = vpop.xlane.xlu1 %588  ;;  %v591_v42 = vpop.xlane.xlu0 %590  ;;  %v833_v23 = vpack.c.bf16 %v809_v63, %v808_v32  ;;  %v710_v14 = vmul.f32 %v2733_v36, %v3381_v40  ;;  %v780_v3 = vadd.f32 %v3449_v45, %v744_v37 }
 0x279   :  { %2746 = vrsqrt.f32 %v653_v24  ;;  %v623_v15 = vmul.f32 0.0078125, %v589_v38  ;;  %v624_v54 = vmul.f32 0.0078125, %v591_v42  ;;  %v811_v58 = vmax.f32 %v779_v39, 0.0 }
 0x27a   :  { %v2735_v29 = vpop.eup %2734  ;;  %2748 = vrsqrt.f32 %v654_v61  ;;  %2575 = vmatmul.mubr.bf16.gmra.mxu1 %v833_v23  ;;  %v745_v2 = vmul.f32 %v3445_v31, %v709_v51  ;;  %v746_v62 = vmul.f32 %v3445_v31, %v710_v14  ;;  %v812_v13 = vmax.f32 %v780_v3, 0.0 }
 0x27b   :  { %v2737_v41 = vpop.eup %2736  ;;  %v655_v5 = vadd.f32 1e-05, %v623_v15  ;;  %v656_v0 = vadd.f32 1e-05, %v624_v54  ;;  %v834_v30 = vpack.c.bf16 %v811_v58, %v810_v48  ;;  %v711_v50 = vmul.f32 %v2735_v29, %v3388_v43 }
 0x27c   :  { %v593_v40 = vpop.xlane.xlu1 %592  ;;  %v781_v9 = vadd.f32 %v3449_v45, %v745_v2  ;;  %v782_v8 = vadd.f32 %v3449_v45, %v746_v62  ;;  %v712_v19 = vmul.f32 %v2737_v41, %v3391_v44 }
 0x27d   :  { %2750 = vrsqrt.f32 %v655_v5  ;;  %v625_v11 = vmul.f32 0.0078125, %v593_v40  ;;  %2578 = vmatprep.mubr.bf16.mxu1 %v834_v30  ;;  %v747_v59 = vmul.f32 %v3445_v31, %v711_v50 }
 0x27e   :  { %v2739_v12 = vpop.eup %2738  ;;  %2752 = vrsqrt.f32 %v656_v0  ;;  %v813_v4 = vmax.f32 %v781_v9, 0.0  ;;  %v748_v20 = vmul.f32 %v3445_v31, %v712_v19  ;;  %v814_v22 = vmax.f32 %v782_v8, 0.0 }
 0x27f   :  { %v2741_v16 = vpop.eup %2740  ;;  %v657_v43 = vadd.f32 1e-05, %v625_v11  ;;  %v783_v35 = vadd.f32 %v3449_v45, %v747_v59  ;;  %v713_v52 = vmul.f32 %v2739_v12, %v3398_v47 }
 0x280   :  { %v835_v21 = vpack.c.bf16 %v813_v4, %v812_v13  ;;  %v714_v44 = vmul.f32 %v2741_v16, %v3401_v46  ;;  %v784_v33 = vadd.f32 %v3449_v45, %v748_v20  ;;  %v860_v13 = vsub.s32 3, %v3146_v57  ;;  %v3547_v20 = vld [vmem:[#allocation10] sm:$0xff] }
 0x281   :  { %2754 = vrsqrt.f32 %v657_v43  ;;  %v815_v1 = vmax.f32 %v783_v35, 0.0  ;;  %v749_v34 = vmul.f32 %v3445_v31, %v713_v52 }
 0x282   :  { %v2743_v60 = vpop.eup %2742  ;;  %2579 = vmatmul.mubr.bf16.gmra.mxu1 %v835_v21  ;;  %v750_v17 = vmul.f32 %v3445_v31, %v714_v44  ;;  %v816_v46 = vmax.f32 %v784_v33, 0.0 }
 0x283   :  { %v2745_v26 = vpop.eup %2744  ;;  %v836_v27 = vpack.c.bf16 %v815_v1, %v814_v22  ;;  %v785_v56 = vadd.f32 %v3449_v45, %v749_v34  ;;  %v715_v47 = vmul.f32 %v2743_v60, %v3408_v7 }
 0x284   :  { %v716_v25 = vmul.f32 %v2745_v26, %v3411_v49  ;;  %v786_v63 = vadd.f32 %v3449_v45, %v750_v17 }
 0x285   :  { %2582 = vmatprep.mubr.bf16.mxu1 %v836_v27  ;;  %v817_v28 = vmax.f32 %v785_v56, 0.0  ;;  %v751_v32 = vmul.f32 %v3445_v31, %v715_v47 }
 0x286   :  { %v2747_v37 = vpop.eup %2746  ;;  %v752_v36 = vmul.f32 %v3445_v31, %v716_v25  ;;  %v818_v38 = vmax.f32 %v786_v63, 0.0 }
 0x287   :  { %v2749_v24 = vpop.eup %2748  ;;  %v837_v61 = vpack.c.bf16 %v817_v28, %v816_v46  ;;  %v787_v39 = vadd.f32 %v3449_v45, %v751_v32  ;;  %v717_v51 = vmul.f32 %v2747_v37, %v3418_v18 }
 0x288   :  { %v718_v7 = vmul.f32 %v2749_v24, %v3421_v53  ;;  %v788_v23 = vadd.f32 %v3449_v45, %v752_v36 }
 0x289   :  { %v819_v49 = vmax.f32 %v787_v39, 0.0  ;;  %v753_v42 = vmul.f32 %v3445_v31, %v717_v51 }
 0x28a   :  { %v2751_v48 = vpop.eup %2750  ;;  %2583 = vmatmul.mubr.bf16.gmra.mxu1 %v837_v61  ;;  %v754_v14 = vmul.f32 %v3445_v31, %v718_v7  ;;  %v820_v53 = vmax.f32 %v788_v23, 0.0 }
 0x28b   :  { %v2753_v15 = vpop.eup %2752  ;;  %v838_v54 = vpack.c.bf16 %v819_v49, %v818_v38  ;;  %v789_v58 = vadd.f32 %v3449_v45, %v753_v42  ;;  %v719_v29 = vmul.f32 %v2751_v48, %v3428_v6 }
 0x28c   :  { %v720_v18 = vmul.f32 %v2753_v15, %v3431_v55  ;;  %v790_v62 = vadd.f32 %v3449_v45, %v754_v14 }
 0x28d   :  { %2586 = vmatprep.mubr.bf16.mxu1 %v838_v54  ;;  %v821_v2 = vmax.f32 %v789_v58, 0.0  ;;  %v755_v3 = vmul.f32 %v3445_v31, %v719_v29 }
 0x28e   :  { %v2755_v41 = vpop.eup %2754  ;;  %v756_v5 = vmul.f32 %v3445_v31, %v720_v18  ;;  %v822_v40 = vmax.f32 %v790_v62, 0.0 }
 0x28f   :  { %v839_v0 = vpack.c.bf16 %v821_v2, %v820_v53  ;;  %v791_v30 = vadd.f32 %v3449_v45, %v755_v3  ;;  %v721_v50 = vmul.f32 %v2755_v41, %v3438_v10  ;;  %v3550_v10 = vrot.slane %v3547_v20, %v860_v13 }
 0x290   :  { %v792_v55 = vadd.f32 %v3449_v45, %v756_v5 }
 0x291   :  { %v823_v9 = vmax.f32 %v791_v30, 0.0  ;;  %v757_v6 = vmul.f32 %v3445_v31, %v721_v50 }
 0x292   :  { %2587 = vmatmul.mubr.bf16.gmra.mxu1 %v839_v0  ;;  %v824_v11 = vmax.f32 %v792_v55, 0.0 }
 0x293   :  { %v840_v8 = vpack.c.bf16 %v823_v9, %v822_v40  ;;  %v793_v19 = vadd.f32 %v3449_v45, %v757_v6 }
 0x295   :  { %2590 = vmatprep.mubr.bf16.mxu1 %v840_v8  ;;  %v825_v59 = vmax.f32 %v793_v19, 0.0 }
 0x297   :  { %v841_v12 = vpack.c.bf16 %v825_v59, %v824_v11 }
 0x29a   :  { %2591 = vmatmul.mubr.bf16.gmra.mxu1 %v841_v12 }
 0x322   :  { %v2564_v4 = vpop.f32.mrf.mxu1 }
 0x323   :  { %v3557_v35 = vadd.f32 %v2564_v4, %v3550_v10 }
 0x324   :  { %v944_v31 = vpop.f32.mrf.mxu1 }
 0x325   :  { %v3553_v16 = vadd.f32 %v944_v31, %v3550_v10 }
 0x326   :  { %v2565_v43 = vpop.f32.mrf.mxu1 }
 0x327   :  { %1071 = vadd.xlane.f32.xlu0 %v3553_v16  ;;  %v3565_v44 = vadd.f32 %v2565_v43, %v3550_v10 }
 0x328   :  { %v947_v45 = vpop.f32.mrf.mxu1 }
 0x329   :  { %v3560_v52 = vadd.f32 %v947_v45, %v3550_v10 }
 0x32a   :  { %v2568_v21 = vpop.f32.mrf.mxu1 }
 0x32b   :  { %1073 = vadd.xlane.f32.xlu1 %v3560_v52  ;;  %1075 = vadd.xlane.f32.xlu0 %v3557_v35  ;;  %v3573_v60 = vadd.f32 %v2568_v21, %v3550_v10 }
 0x32c   :  { %v960_v22 = vpop.f32.mrf.mxu1 }
 0x32d   :  { %v3568_v1 = vadd.f32 %v960_v22, %v3550_v10 }
 0x32e   :  { %v2569_v34 = vpop.f32.mrf.mxu1 }
 0x32f   :  { %1077 = vadd.xlane.f32.xlu1 %v3565_v44  ;;  %1079 = vadd.xlane.f32.xlu0 %v3568_v1  ;;  %v3581_v56 = vadd.f32 %v2569_v34, %v3550_v10 }
 0x330   :  { %v963_v33 = vpop.f32.mrf.mxu1 }
 0x331   :  { %v3576_v17 = vadd.f32 %v963_v33, %v3550_v10 }
 0x332   :  { %v2572_v26 = vpop.f32.mrf.mxu1 }
 0x333   :  { %1081 = vadd.xlane.f32.xlu1 %v3576_v17  ;;  %1083 = vadd.xlane.f32.xlu0 %v3573_v60  ;;  %v3589_v28 = vadd.f32 %v2572_v26, %v3550_v10 }
 0x334   :  { %v976_v27 = vpop.f32.mrf.mxu1 }
 0x335   :  { %v3584_v47 = vadd.f32 %v976_v27, %v3550_v10 }
 0x336   :  { %v2573_v25 = vpop.f32.mrf.mxu1 }
 0x337   :  { %1085 = vadd.xlane.f32.xlu1 %v3581_v56  ;;  %1087 = vadd.xlane.f32.xlu0 %v3584_v47  ;;  %v3597_v36 = vadd.f32 %v2573_v25, %v3550_v10 }
 0x338   :  { %v979_v46 = vpop.f32.mrf.mxu1 }
 0x339   :  { %v3592_v32 = vadd.f32 %v979_v46, %v3550_v10 }
 0x33a   :  { %v2576_v63 = vpop.f32.mrf.mxu1 }
 0x33b   :  { %1089 = vadd.xlane.f32.xlu1 %v3592_v32  ;;  %1091 = vadd.xlane.f32.xlu0 %v3589_v28  ;;  %v3605_v51 = vadd.f32 %v2576_v63, %v3550_v10 }
 0x33c   :  { %v992_v37 = vpop.f32.mrf.mxu1 }
 0x33d   :  { %v3600_v24 = vadd.f32 %v992_v37, %v3550_v10 }
 0x33e   :  { %v2577_v61 = vpop.f32.mrf.mxu1 }
 0x33f   :  { %1093 = vadd.xlane.f32.xlu1 %v3597_v36  ;;  %1095 = vadd.xlane.f32.xlu0 %v3600_v24  ;;  %v3613_v42 = vadd.f32 %v2577_v61, %v3550_v10 }
 0x340   :  { %v995_v39 = vpop.f32.mrf.mxu1 }
 0x341   :  { %v3608_v7 = vadd.f32 %v995_v39, %v3550_v10 }
 0x342   :  { %v2580_v38 = vpop.f32.mrf.mxu1 }
 0x343   :  { %1097 = vadd.xlane.f32.xlu1 %v3608_v7  ;;  %1099 = vadd.xlane.f32.xlu0 %v3605_v51  ;;  %v3621_v15 = vadd.f32 %v2580_v38, %v3550_v10 }
 0x344   :  { %v1008_v49 = vpop.f32.mrf.mxu1 }
 0x345   :  { %v3616_v23 = vadd.f32 %v1008_v49, %v3550_v10 }
 0x346   :  { %v2581_v48 = vpop.f32.mrf.mxu1 }
 0x347   :  { %1101 = vadd.xlane.f32.xlu1 %v3613_v42  ;;  %1103 = vadd.xlane.f32.xlu0 %v3616_v23  ;;  %v3629_v18 = vadd.f32 %v2581_v48, %v3550_v10 }
 0x348   :  { %v1011_v14 = vpop.f32.mrf.mxu1 }
 0x349   :  { %v3624_v54 = vadd.f32 %v1011_v14, %v3550_v10 }
 0x34a   :  { %v2584_v58 = vpop.f32.mrf.mxu1 }
 0x34b   :  { %1105 = vadd.xlane.f32.xlu1 %v3624_v54  ;;  %1107 = vadd.xlane.f32.xlu0 %v3621_v15  ;;  %v3637_v62 = vadd.f32 %v2584_v58, %v3550_v10 }
 0x34c   :  { %v1024_v29 = vpop.f32.mrf.mxu1 }
 0x34d   :  { %v3632_v53 = vadd.f32 %v1024_v29, %v3550_v10 }
 0x34e   :  { %v2585_v2 = vpop.f32.mrf.mxu1 }
 0x34f   :  { %1109 = vadd.xlane.f32.xlu1 %v3629_v18  ;;  %1111 = vadd.xlane.f32.xlu0 %v3632_v53  ;;  %v3645_v30 = vadd.f32 %v2585_v2, %v3550_v10 }
 0x350   :  { %v1027_v3 = vpop.f32.mrf.mxu1 }
 0x351   :  { %v3640_v41 = vadd.f32 %v1027_v3, %v3550_v10 }
 0x352   :  { %v2588_v5 = vpop.f32.mrf.mxu1 }
 0x353   :  { %1113 = vadd.xlane.f32.xlu1 %v3640_v41  ;;  %1115 = vadd.xlane.f32.xlu0 %v3637_v62  ;;  %v3653_v6 = vadd.f32 %v2588_v5, %v3550_v10 }
 0x354   :  { %v1040_v0 = vpop.f32.mrf.mxu1 }
 0x355   :  { %v3648_v50 = vadd.f32 %v1040_v0, %v3550_v10 }
 0x356   :  { %v2589_v40 = vpop.f32.mrf.mxu1 }
 0x357   :  { %1117 = vadd.xlane.f32.xlu1 %v3645_v30  ;;  %1119 = vadd.xlane.f32.xlu0 %v3648_v50  ;;  %v3661_v11 = vadd.f32 %v2589_v40, %v3550_v10 }
 0x358   :  { %v1043_v9 = vpop.f32.mrf.mxu1 }
 0x359   :  { %v3656_v55 = vadd.f32 %v1043_v9, %v3550_v10 }
 0x35a   :  { %v2592_v8 = vpop.f32.mrf.mxu1 }
 0x35b   :  { %1121 = vadd.xlane.f32.xlu1 %v3656_v55  ;;  %1123 = vadd.xlane.f32.xlu0 %v3653_v6  ;;  %v3669_v4 = vadd.f32 %v2592_v8, %v3550_v10 }
 0x35c   :  { %v1056_v19 = vpop.f32.mrf.mxu1 }
 0x35d   :  { %v3664_v59 = vadd.f32 %v1056_v19, %v3550_v10 }
 0x35e   :  { %v2593_v12 = vpop.f32.mrf.mxu1 }
 0x35f   :  { %1125 = vadd.xlane.f32.xlu1 %v3661_v11  ;;  %1127 = vadd.xlane.f32.xlu0 %v3664_v59  ;;  %v3677_v43 = vadd.f32 %v2593_v12, %v3550_v10 }
 0x360   :  { %v1059_v13 = vpop.f32.mrf.mxu1 }
 0x361   :  { %v3672_v31 = vadd.f32 %v1059_v13, %v3550_v10 }
 0x363   :  { %1129 = vadd.xlane.f32.xlu1 %v3672_v31  ;;  %1131 = vadd.xlane.f32.xlu0 %v3669_v4 }
 0x367   :  { %1133 = vadd.xlane.f32.xlu1 %v3677_v43 }
 0x3b0   :  { %v1072_v45 = vpop.xlane.xlu0 %1071 }
 0x3b1   :  { %v1135_v21 = vmul.f32 0.0078125, %v1072_v45 }
 0x3b3   :  { %v3681_v22 = vsub.f32 %v3553_v16, %v1135_v21 }
 0x3b4   :  { %v1074_v34 = vpop.xlane.xlu1 %1073  ;;  %v1076_v33 = vpop.xlane.xlu0 %1075 }
 0x3b5   :  { %v1136_v26 = vmul.f32 0.0078125, %v1074_v34  ;;  %v1137_v27 = vmul.f32 0.0078125, %v1076_v33  ;;  %v1199_v25 = vmul.f32 %v3681_v22, %v3681_v22 }
 0x3b7   :  { %v3686_v46 = vsub.f32 %v3557_v35, %v1137_v27  ;;  %1231 = vadd.xlane.f32.xlu0 %v1199_v25  ;;  %v3689_v10 = vsub.f32 %v3560_v52, %v1136_v26  ;;  %v2685_v25 = vld [vmem:[#allocation8 + $0x30] sm:$0xff]  }
 0x3b8   :  { %v1078_v63 = vpop.xlane.xlu1 %1077  ;;  %v1080_v37 = vpop.xlane.xlu0 %1079 }
 0x3b9   :  { %v1138_v61 = vmul.f32 0.0078125, %v1078_v63  ;;  %v1139_v39 = vmul.f32 0.0078125, %v1080_v37  ;;  %v1200_v16 = vmul.f32 %v3689_v10, %v3689_v10  ;;  %v1201_v38 = vmul.f32 %v3686_v46, %v3686_v46 }
 0x3bb   :  { %v3696_v49 = vsub.f32 %v3565_v44, %v1138_v61  ;;  %v3699_v35 = vsub.f32 %v3568_v1, %v1139_v39  ;;  %1233 = vadd.xlane.f32.xlu1 %v1200_v16  ;;  %1235 = vadd.xlane.f32.xlu0 %v1201_v38 }
 0x3bc   :  { %v1082_v52 = vpop.xlane.xlu1 %1081  ;;  %v1084_v48 = vpop.xlane.xlu0 %1083 }
 0x3bd   :  { %v1140_v14 = vmul.f32 0.0078125, %v1082_v52  ;;  %v1141_v58 = vmul.f32 0.0078125, %v1084_v48  ;;  %v1202_v29 = vmul.f32 %v3696_v49, %v3696_v49  ;;  %v1203_v2 = vmul.f32 %v3699_v35, %v3699_v35  ;;  %v2686_v52 = vld [vmem:[#allocation8 + $0x28] sm:$0xff]  }
 0x3bf   :  { %v3706_v3 = vsub.f32 %v3576_v17, %v1140_v14  ;;  %v3709_v44 = vsub.f32 %v3573_v60, %v1141_v58  ;;  %1237 = vadd.xlane.f32.xlu1 %v1202_v29  ;;  %1239 = vadd.xlane.f32.xlu0 %v1203_v2  ;;  %v2684_v60 = vld [vmem:[#allocation8 + $0x38] sm:$0xff]  }
 0x3c0   :  { %v1086_v1 = vpop.xlane.xlu1 %1085  ;;  %v1088_v5 = vpop.xlane.xlu0 %1087  ;;  %2594 = vmatprep.subr.bf16.mxu0 %v2684_v60 }
 0x3c1   :  { %v1142_v0 = vmul.f32 0.0078125, %v1086_v1  ;;  %v1143_v40 = vmul.f32 0.0078125, %v1088_v5  ;;  %v1204_v9 = vmul.f32 %v3706_v3, %v3706_v3  ;;  %v1205_v8 = vmul.f32 %v3709_v44, %v3709_v44  ;;  %2595 = vmatpush3.bf16.msra.mxu0 %v2684_v60  ;;  %v2687_v5 = vld [vmem:[#allocation8 + $0x20] sm:$0xff]  }
 0x3c2   :  { %2596 = vmatprep.subr.bf16.mxu0 %v2685_v25 }
 0x3c3   :  { %v3716_v19 = vsub.f32 %v3581_v56, %v1142_v0  ;;  %v3719_v17 = vsub.f32 %v3584_v47, %v1143_v40  ;;  %1241 = vadd.xlane.f32.xlu1 %v1204_v9  ;;  %1243 = vadd.xlane.f32.xlu0 %v1205_v8 }
 0x3c4   :  { %v1090_v12 = vpop.xlane.xlu1 %1089  ;;  %v1092_v13 = vpop.xlane.xlu0 %1091 }
 0x3c5   :  { %v1144_v45 = vmul.f32 0.0078125, %v1090_v12  ;;  %v1145_v21 = vmul.f32 0.0078125, %v1092_v13  ;;  %v1206_v34 = vmul.f32 %v3716_v19, %v3716_v19  ;;  %v1207_v33 = vmul.f32 %v3719_v17, %v3719_v17  ;;  %2597 = vmatpush3.bf16.msra.mxu0 %v2685_v25  ;;  %v2688_v13 = vld [vmem:[#allocation8 + $0x18] sm:$0xff]   ;;  %v2689_v25 = vld [vmem:[#allocation8 + $0x10] sm:$0xff]  }
 0x3c6   :  { %2598 = vmatprep.subr.bf16.mxu0 %v2686_v52 }
 0x3c7   :  { %v3726_v56 = vsub.f32 %v3592_v32, %v1144_v45  ;;  %v3729_v47 = vsub.f32 %v3589_v28, %v1145_v21  ;;  %1245 = vadd.xlane.f32.xlu1 %v1206_v34  ;;  %1247 = vadd.xlane.f32.xlu0 %v1207_v33 }
 0x3c8   :  { %v1094_v26 = vpop.xlane.xlu1 %1093  ;;  %v1096_v27 = vpop.xlane.xlu0 %1095 }
 0x3c9   :  { %v1146_v63 = vmul.f32 0.0078125, %v1094_v26  ;;  %v1147_v37 = vmul.f32 0.0078125, %v1096_v27  ;;  %v1208_v61 = vmul.f32 %v3726_v56, %v3726_v56  ;;  %v1209_v39 = vmul.f32 %v3729_v47, %v3729_v47  ;;  %2599 = vmatpush3.bf16.msra.mxu0 %v2686_v52  ;;  %v2690_v52 = vld [vmem:[#allocation8 + $0x8] sm:$0xff]  }
 0x3ca   :  { %2600 = vmatprep.subr.bf16.mxu0 %v2687_v5 }
 0x3cb   :  { %v3736_v32 = vsub.f32 %v3597_v36, %v1146_v63  ;;  %v3739_v28 = vsub.f32 %v3600_v24, %v1147_v37  ;;  %1249 = vadd.xlane.f32.xlu1 %v1208_v61  ;;  %1251 = vadd.xlane.f32.xlu0 %v1209_v39 }
 0x3cc   :  { %v1098_v16 = vpop.xlane.xlu1 %1097  ;;  %v1100_v38 = vpop.xlane.xlu0 %1099 }
 0x3cd   :  { %v1148_v48 = vmul.f32 0.0078125, %v1098_v16  ;;  %v1149_v14 = vmul.f32 0.0078125, %v1100_v38  ;;  %v1210_v58 = vmul.f32 %v3736_v32, %v3736_v32  ;;  %v1211_v29 = vmul.f32 %v3739_v28, %v3739_v28  ;;  %2601 = vmatpush3.bf16.msra.mxu0 %v2687_v5  ;;  %v2691_v5 = vld [vmem:[#allocation8] sm:$0xff]  }
 0x3ce   :  { %2602 = vmatprep.subr.bf16.mxu0 %v2688_v13 }
 0x3cf   :  { %v3746_v36 = vsub.f32 %v3608_v7, %v1148_v48  ;;  %v3749_v24 = vsub.f32 %v3605_v51, %v1149_v14  ;;  %1253 = vadd.xlane.f32.xlu1 %v1210_v58  ;;  %1255 = vadd.xlane.f32.xlu0 %v1211_v29 }
 0x3d0   :  { %v1102_v2 = vpop.xlane.xlu1 %1101  ;;  %v1104_v1 = vpop.xlane.xlu0 %1103 }
 0x3d1   :  { %v1150_v0 = vmul.f32 0.0078125, %v1102_v2  ;;  %v1151_v40 = vmul.f32 0.0078125, %v1104_v1  ;;  %v1212_v9 = vmul.f32 %v3746_v36, %v3746_v36  ;;  %v1213_v8 = vmul.f32 %v3749_v24, %v3749_v24  ;;  %2603 = vmatpush3.bf16.msra.mxu0 %v2688_v13 }
 0x3d2   :  { %2604 = vmatprep.subr.bf16.mxu0 %v2689_v25 }
 0x3d3   :  { %v3756_v7 = vsub.f32 %v3613_v42, %v1150_v0  ;;  %v3759_v51 = vsub.f32 %v3616_v23, %v1151_v40  ;;  %1257 = vadd.xlane.f32.xlu1 %v1212_v9  ;;  %1259 = vadd.xlane.f32.xlu0 %v1213_v8 }
 0x3d4   :  { %v1106_v60 = vpop.xlane.xlu1 %1105  ;;  %v1108_v12 = vpop.xlane.xlu0 %1107 }
 0x3d5   :  { %v1152_v45 = vmul.f32 0.0078125, %v1106_v60  ;;  %v1153_v21 = vmul.f32 0.0078125, %v1108_v12  ;;  %v1214_v34 = vmul.f32 %v3756_v7, %v3756_v7  ;;  %v1215_v33 = vmul.f32 %v3759_v51, %v3759_v51  ;;  %2605 = vmatpush3.bf16.msra.mxu0 %v2689_v25 }
 0x3d6   :  { %2606 = vmatprep.subr.bf16.mxu0 %v2690_v52 }
 0x3d7   :  { %v3766_v42 = vsub.f32 %v3624_v54, %v1152_v45  ;;  %v3769_v23 = vsub.f32 %v3621_v15, %v1153_v21  ;;  %1261 = vadd.xlane.f32.xlu1 %v1214_v34  ;;  %1263 = vadd.xlane.f32.xlu0 %v1215_v33 }
 0x3d8   :  { %v1110_v26 = vpop.xlane.xlu1 %1109  ;;  %v1112_v27 = vpop.xlane.xlu0 %1111 }
 0x3d9   :  { %v1154_v63 = vmul.f32 0.0078125, %v1110_v26  ;;  %v1155_v37 = vmul.f32 0.0078125, %v1112_v27  ;;  %v1216_v61 = vmul.f32 %v3766_v42, %v3766_v42  ;;  %v1217_v39 = vmul.f32 %v3769_v23, %v3769_v23  ;;  %2607 = vmatpush3.bf16.msra.mxu0 %v2690_v52 }
 0x3da   :  { %2608 = vmatprep.subr.bf16.mxu0 %v2691_v5 }
 0x3db   :  { %v3776_v54 = vsub.f32 %v3629_v18, %v1154_v63  ;;  %v3779_v15 = vsub.f32 %v3632_v53, %v1155_v37  ;;  %1265 = vadd.xlane.f32.xlu1 %v1216_v61  ;;  %1267 = vadd.xlane.f32.xlu0 %v1217_v39 }
 0x3dc   :  { %v1114_v16 = vpop.xlane.xlu1 %1113  ;;  %v1116_v38 = vpop.xlane.xlu0 %1115 }
 0x3dd   :  { %v1156_v48 = vmul.f32 0.0078125, %v1114_v16  ;;  %v1157_v14 = vmul.f32 0.0078125, %v1116_v38  ;;  %v1218_v58 = vmul.f32 %v3776_v54, %v3776_v54  ;;  %v1219_v29 = vmul.f32 %v3779_v15, %v3779_v15  ;;  %2609 = vmatpush3.bf16.msra.mxu0 %v2691_v5 }
 0x3df   :  { %v3786_v18 = vsub.f32 %v3640_v41, %v1156_v48  ;;  %v3789_v53 = vsub.f32 %v3637_v62, %v1157_v14  ;;  %1269 = vadd.xlane.f32.xlu1 %v1218_v58  ;;  %1271 = vadd.xlane.f32.xlu0 %v1219_v29 }
 0x3e0   :  { %v1118_v2 = vpop.xlane.xlu1 %1117  ;;  %v1120_v1 = vpop.xlane.xlu0 %1119 }
 0x3e1   :  { %v1158_v0 = vmul.f32 0.0078125, %v1118_v2  ;;  %v1159_v40 = vmul.f32 0.0078125, %v1120_v1  ;;  %v1220_v9 = vmul.f32 %v3786_v18, %v3786_v18  ;;  %v1221_v8 = vmul.f32 %v3789_v53, %v3789_v53 }
 0x3e3   :  { %v3796_v41 = vsub.f32 %v3645_v30, %v1158_v0  ;;  %v3799_v62 = vsub.f32 %v3648_v50, %v1159_v40  ;;  %1273 = vadd.xlane.f32.xlu1 %v1220_v9  ;;  %1275 = vadd.xlane.f32.xlu0 %v1221_v8 }
 0x3e4   :  { %v1122_v60 = vpop.xlane.xlu1 %1121  ;;  %v1124_v12 = vpop.xlane.xlu0 %1123 }
 0x3e5   :  { %v1160_v13 = vmul.f32 0.0078125, %v1122_v60  ;;  %v1161_v45 = vmul.f32 0.0078125, %v1124_v12  ;;  %v1222_v21 = vmul.f32 %v3796_v41, %v3796_v41  ;;  %v1223_v34 = vmul.f32 %v3799_v62, %v3799_v62 }
 0x3e7   :  { %v3806_v33 = vsub.f32 %v3656_v55, %v1160_v13  ;;  %v3809_v30 = vsub.f32 %v3653_v6, %v1161_v45  ;;  %1277 = vadd.xlane.f32.xlu1 %v1222_v21  ;;  %1279 = vadd.xlane.f32.xlu0 %v1223_v34 }
 0x3e8   :  { %v1126_v50 = vpop.xlane.xlu1 %1125  ;;  %v1128_v26 = vpop.xlane.xlu0 %1127 }
 0x3e9   :  { %v1162_v27 = vmul.f32 0.0078125, %v1126_v50  ;;  %v1163_v25 = vmul.f32 0.0078125, %v1128_v26  ;;  %v1224_v63 = vmul.f32 %v3806_v33, %v3806_v33  ;;  %v1225_v37 = vmul.f32 %v3809_v30, %v3809_v30 }
 0x3eb   :  { %v3816_v61 = vsub.f32 %v3661_v11, %v1162_v27  ;;  %v3819_v55 = vsub.f32 %v3664_v59, %v1163_v25  ;;  %1281 = vadd.xlane.f32.xlu1 %v1224_v63  ;;  %1283 = vadd.xlane.f32.xlu0 %v1225_v37 }
 0x3ec   :  { %v1130_v6 = vpop.xlane.xlu1 %1129  ;;  %v1132_v39 = vpop.xlane.xlu0 %1131 }
 0x3ed   :  { %v1164_v16 = vmul.f32 0.0078125, %v1130_v6  ;;  %v1165_v38 = vmul.f32 0.0078125, %v1132_v39  ;;  %v1226_v52 = vmul.f32 %v3816_v61, %v3816_v61  ;;  %v1227_v48 = vmul.f32 %v3819_v55, %v3819_v55 }
 0x3ee   :  { %v1425_v6 = vsub.s32 4, %v3146_v57 }
 0x3ef   :  { %v3826_v14 = vsub.f32 %v3672_v31, %v1164_v16  ;;  %v3829_v11 = vsub.f32 %v3669_v4, %v1165_v38  ;;  %1285 = vadd.xlane.f32.xlu1 %v1226_v52  ;;  %1287 = vadd.xlane.f32.xlu0 %v1227_v48  ;;  %v1461_v48 = vsub.s32 5, %v3146_v57 }
 0x3f0   :  { %v1134_v59 = vpop.xlane.xlu1 %1133 }
 0x3f1   :  { %v1166_v58 = vmul.f32 0.0078125, %v1134_v59  ;;  %v1228_v29 = vmul.f32 %v3826_v14, %v3826_v14  ;;  %v1229_v2 = vmul.f32 %v3829_v11, %v3829_v11 }
 0x3f3   :  { %v3836_v1 = vsub.f32 %v3677_v43, %v1166_v58  ;;  %1289 = vadd.xlane.f32.xlu1 %v1228_v29  ;;  %1291 = vadd.xlane.f32.xlu0 %v1229_v2  ;;  %v3843_v29 = vrot.slane %v3547_v20, %v1425_v6 }
 0x3f5   :  { %v1230_v31 = vmul.f32 %v3836_v1, %v3836_v1 }
 0x3f7   :  { %1293 = vadd.xlane.f32.xlu1 %v1230_v31 }
 0x440   :  { %v1232_v4 = vpop.xlane.xlu0 %1231 }
 0x441   :  { %v1295_v5 = vmul.f32 0.0078125, %v1232_v4 }
 0x443   :  { %v1327_v0 = vadd.f32 1e-05, %v1295_v5 }
 0x444   :  { %v1234_v40 = vpop.xlane.xlu1 %1233  ;;  %v1236_v9 = vpop.xlane.xlu0 %1235 }
 0x445   :  { %2756 = vrsqrt.f32 %v1327_v0  ;;  %v1296_v8 = vmul.f32 0.0078125, %v1234_v40  ;;  %v1297_v60 = vmul.f32 0.0078125, %v1236_v9  ;;  %v3847_v9 = vrot.slane %v3547_v20, %v1461_v48 }
 0x447   :  { %v1328_v12 = vadd.f32 1e-05, %v1296_v8  ;;  %v1329_v13 = vadd.f32 1e-05, %v1297_v60 }
 0x448   :  { %v1238_v45 = vpop.xlane.xlu1 %1237  ;;  %v1240_v21 = vpop.xlane.xlu0 %1239 }
 0x449   :  { %2758 = vrsqrt.f32 %v1328_v12  ;;  %v1298_v43 = vmul.f32 0.0078125, %v1238_v45  ;;  %v1299_v34 = vmul.f32 0.0078125, %v1240_v21 }
 0x44a   :  { %2760 = vrsqrt.f32 %v1329_v13 }
 0x44b   :  { %v1330_v50 = vadd.f32 1e-05, %v1298_v43  ;;  %v1331_v26 = vadd.f32 1e-05, %v1299_v34 }
 0x44c   :  { %v1242_v27 = vpop.xlane.xlu1 %1241  ;;  %v1244_v25 = vpop.xlane.xlu0 %1243 }
 0x44d   :  { %2762 = vrsqrt.f32 %v1330_v50  ;;  %v1300_v63 = vmul.f32 0.0078125, %v1242_v27  ;;  %v1301_v37 = vmul.f32 0.0078125, %v1244_v25 }
 0x44e   :  { %2764 = vrsqrt.f32 %v1331_v26 }
 0x44f   :  { %v1332_v39 = vadd.f32 1e-05, %v1300_v63  ;;  %v1333_v16 = vadd.f32 1e-05, %v1301_v37 }
 0x450   :  { %v1246_v38 = vpop.xlane.xlu1 %1245  ;;  %v1248_v52 = vpop.xlane.xlu0 %1247 }
 0x451   :  { %2766 = vrsqrt.f32 %v1332_v39  ;;  %v1302_v59 = vmul.f32 0.0078125, %v1246_v38  ;;  %v1303_v58 = vmul.f32 0.0078125, %v1248_v52 }
 0x452   :  { %v2757_v2 = vpop.eup %2756  ;;  %2768 = vrsqrt.f32 %v1333_v16 }
 0x453   :  { %v1334_v31 = vadd.f32 1e-05, %v1302_v59  ;;  %v1335_v4 = vadd.f32 1e-05, %v1303_v58  ;;  %v1391_v5 = vmul.f32 %v2757_v2, %v3681_v22 }
 0x454   :  { %v1250_v0 = vpop.xlane.xlu1 %1249  ;;  %v1252_v40 = vpop.xlane.xlu0 %1251 }
 0x455   :  { %2770 = vrsqrt.f32 %v1334_v31  ;;  %v1304_v8 = vmul.f32 0.0078125, %v1250_v0  ;;  %v1305_v57 = vmul.f32 0.0078125, %v1252_v40  ;;  %v1427_v60 = vmul.f32 %v3843_v29, %v1391_v5 }
 0x456   :  { %v2759_v12 = vpop.eup %2758  ;;  %2772 = vrsqrt.f32 %v1335_v4 }
 0x457   :  { %v2761_v13 = vpop.eup %2760  ;;  %v1336_v45 = vadd.f32 1e-05, %v1304_v8  ;;  %v1337_v21 = vadd.f32 1e-05, %v1305_v57  ;;  %v1392_v43 = vmul.f32 %v2759_v12, %v3689_v10  ;;  %v1463_v26 = vadd.f32 %v3847_v9, %v1427_v60 }
 0x458   :  { %v1393_v34 = vmul.f32 %v2761_v13, %v3686_v46  ;;  %v1254_v22 = vpop.xlane.xlu1 %1253  ;;  %v1256_v50 = vpop.xlane.xlu0 %1255 }
 0x459   :  { %2774 = vrsqrt.f32 %v1336_v45  ;;  %v1306_v20 = vmul.f32 0.0078125, %v1254_v22  ;;  %v1307_v27 = vmul.f32 0.0078125, %v1256_v50  ;;  %v1428_v25 = vmul.f32 %v3843_v29, %v1392_v43 }
 0x45a   :  { %v2763_v63 = vpop.eup %2762  ;;  %2776 = vrsqrt.f32 %v1337_v21  ;;  %v1429_v37 = vmul.f32 %v3843_v29, %v1393_v34  ;;  %v1495_v48 = vmax.f32 %v1463_v26, 0.0 }
 0x45b   :  { %v2765_v6 = vpop.eup %2764  ;;  %v1394_v39 = vmul.f32 %v2763_v63, %v3696_v49  ;;  %v1338_v16 = vadd.f32 1e-05, %v1306_v20  ;;  %v1339_v10 = vadd.f32 1e-05, %v1307_v27  ;;  %v1464_v46 = vadd.f32 %v3847_v9, %v1428_v25 }
 0x45c   :  { %v1258_v38 = vpop.xlane.xlu1 %1257  ;;  %v1260_v52 = vpop.xlane.xlu0 %1259  ;;  %v1395_v59 = vmul.f32 %v2765_v6, %v3699_v35  ;;  %v1465_v0 = vadd.f32 %v3847_v9, %v1429_v37 }
 0x45d   :  { %2778 = vrsqrt.f32 %v1338_v16  ;;  %v1308_v58 = vmul.f32 0.0078125, %v1258_v38  ;;  %v1309_v2 = vmul.f32 0.0078125, %v1260_v52  ;;  %v1496_v31 = vmax.f32 %v1464_v46, 0.0 }
 0x45e   :  { %v2767_v4 = vpop.eup %2766  ;;  %2780 = vrsqrt.f32 %v1339_v10  ;;  %v1430_v5 = vmul.f32 %v3843_v29, %v1394_v39  ;;  %v1431_v49 = vmul.f32 %v3843_v29, %v1395_v59  ;;  %v1497_v20 = vmax.f32 %v1465_v0, 0.0 }
 0x45f   :  { %v2769_v40 = vpop.eup %2768  ;;  %v1340_v8 = vadd.f32 1e-05, %v1308_v58  ;;  %v1341_v57 = vadd.f32 1e-05, %v1309_v2  ;;  %v1527_v60 = vpack.c.bf16 %v1496_v31, %v1495_v48  ;;  %v1396_v12 = vmul.f32 %v2767_v4, %v3706_v3 }
 0x460   :  { %v1262_v13 = vpop.xlane.xlu1 %1261  ;;  %v1264_v35 = vpop.xlane.xlu0 %1263  ;;  %v1466_v45 = vadd.f32 %v3847_v9, %v1430_v5  ;;  %v1467_v21 = vadd.f32 %v3847_v9, %v1431_v49  ;;  %v1397_v43 = vmul.f32 %v2769_v40, %v3709_v44 }
 0x461   :  { %2782 = vrsqrt.f32 %v1340_v8  ;;  %v1310_v34 = vmul.f32 0.0078125, %v1262_v13  ;;  %v1311_v22 = vmul.f32 0.0078125, %v1264_v35  ;;  %2610 = vmatprep.mubr.bf16.mxu0 %v1527_v60  ;;  %v1432_v50 = vmul.f32 %v3843_v29, %v1396_v12 }
 0x462   :  { %v2771_v26 = vpop.eup %2770  ;;  %2784 = vrsqrt.f32 %v1341_v57  ;;  %v1498_v27 = vmax.f32 %v1466_v45, 0.0  ;;  %v1433_v3 = vmul.f32 %v3843_v29, %v1397_v43  ;;  %v1499_v46 = vmax.f32 %v1467_v21, 0.0 }
 0x463   :  { %v2773_v25 = vpop.eup %2772  ;;  %v1342_v63 = vadd.f32 1e-05, %v1310_v34  ;;  %v1343_v37 = vadd.f32 1e-05, %v1311_v22  ;;  %v1468_v6 = vadd.f32 %v3847_v9, %v1432_v50  ;;  %v1398_v39 = vmul.f32 %v2771_v26, %v3716_v19 }
 0x464   :  { %v1266_v44 = vpop.xlane.xlu1 %1265  ;;  %v1268_v16 = vpop.xlane.xlu0 %1267  ;;  %v1528_v10 = vpack.c.bf16 %v1498_v27, %v1497_v20  ;;  %v1399_v38 = vmul.f32 %v2773_v25, %v3719_v17  ;;  %v1469_v31 = vadd.f32 %v3847_v9, %v1433_v3 }
 0x465   :  { %2786 = vrsqrt.f32 %v1342_v63  ;;  %v1312_v52 = vmul.f32 0.0078125, %v1266_v44  ;;  %v1313_v48 = vmul.f32 0.0078125, %v1268_v16  ;;  %v1500_v59 = vmax.f32 %v1468_v6, 0.0 }
 0x466   :  { %v2775_v58 = vpop.eup %2774  ;;  %2788 = vrsqrt.f32 %v1343_v37  ;;  %2611 = vmatmul.mubr.bf16.vlgmr.msra.gmra.mxu0 %v1528_v10  ;;  %v1434_v2 = vmul.f32 %v3843_v29, %v1398_v39  ;;  %v1435_v4 = vmul.f32 %v3843_v29, %v1399_v38  ;;  %v1501_v43 = vmax.f32 %v1469_v31, 0.0 }
 0x467   :  { %v2777_v19 = vpop.eup %2776  ;;  %v1344_v5 = vadd.f32 1e-05, %v1312_v52  ;;  %v1345_v0 = vadd.f32 1e-05, %v1313_v48  ;;  %v1529_v49 = vpack.c.bf16 %v1500_v59, %v1499_v46  ;;  %v1400_v40 = vmul.f32 %v2775_v58, %v3726_v56 }
 0x468   :  { %v1270_v17 = vpop.xlane.xlu1 %1269  ;;  %v1272_v8 = vpop.xlane.xlu0 %1271  ;;  %v1470_v57 = vadd.f32 %v3847_v9, %v1434_v2  ;;  %v1471_v60 = vadd.f32 %v3847_v9, %v1435_v4  ;;  %v1401_v12 = vmul.f32 %v2777_v19, %v3729_v47 }
 0x469   :  { %2790 = vrsqrt.f32 %v1344_v5  ;;  %v1314_v13 = vmul.f32 0.0078125, %v1270_v17  ;;  %v1315_v35 = vmul.f32 0.0078125, %v1272_v8  ;;  %2614 = vmatprep.mubr.bf16.mxu0 %v1529_v49  ;;  %v1436_v45 = vmul.f32 %v3843_v29, %v1400_v40 }
 0x46a   :  { %v2779_v21 = vpop.eup %2778  ;;  %2792 = vrsqrt.f32 %v1345_v0  ;;  %v1502_v34 = vmax.f32 %v1470_v57, 0.0  ;;  %v1437_v56 = vmul.f32 %v3843_v29, %v1401_v12  ;;  %v1503_v63 = vmax.f32 %v1471_v60, 0.0 }
 0x46b   :  { %v2781_v22 = vpop.eup %2780  ;;  %v1346_v50 = vadd.f32 1e-05, %v1314_v13  ;;  %v1347_v26 = vadd.f32 1e-05, %v1315_v35  ;;  %v1472_v20 = vadd.f32 %v3847_v9, %v1436_v45  ;;  %v1402_v27 = vmul.f32 %v2779_v21, %v3736_v32 }
 0x46c   :  { %v1274_v47 = vpop.xlane.xlu1 %1273  ;;  %v1276_v3 = vpop.xlane.xlu0 %1275  ;;  %v1530_v25 = vpack.c.bf16 %v1502_v34, %v1501_v43  ;;  %v1403_v37 = vmul.f32 %v2781_v22, %v3739_v28  ;;  %v1473_v46 = vadd.f32 %v3847_v9, %v1437_v56 }
 0x46d   :  { %2794 = vrsqrt.f32 %v1346_v50  ;;  %v1316_v6 = vmul.f32 0.0078125, %v1274_v47  ;;  %v1317_v39 = vmul.f32 0.0078125, %v1276_v3  ;;  %v1504_v44 = vmax.f32 %v1472_v20, 0.0 }
 0x46e   :  { %v2783_v16 = vpop.eup %2782  ;;  %2796 = vrsqrt.f32 %v1347_v26  ;;  %2615 = vmatmul.mubr.bf16.gmra.mxu0 %v1530_v25  ;;  %v1438_v10 = vmul.f32 %v3843_v29, %v1402_v27  ;;  %v1439_v38 = vmul.f32 %v3843_v29, %v1403_v37  ;;  %v1505_v17 = vmax.f32 %v1473_v46, 0.0 }
 0x46f   :  { %v2785_v32 = vpop.eup %2784  ;;  %v1348_v52 = vadd.f32 1e-05, %v1316_v6  ;;  %v1349_v48 = vadd.f32 1e-05, %v1317_v39  ;;  %v1531_v59 = vpack.c.bf16 %v1504_v44, %v1503_v63  ;;  %v1404_v58 = vmul.f32 %v2783_v16, %v3746_v36 }
 0x470   :  { %v1278_v28 = vpop.xlane.xlu1 %1277  ;;  %v1280_v2 = vpop.xlane.xlu0 %1279  ;;  %v1474_v31 = vadd.f32 %v3847_v9, %v1438_v10  ;;  %v1475_v4 = vadd.f32 %v3847_v9, %v1439_v38  ;;  %v1405_v19 = vmul.f32 %v2785_v32, %v3749_v24 }
 0x471   :  { %2798 = vrsqrt.f32 %v1348_v52  ;;  %v1318_v5 = vmul.f32 0.0078125, %v1278_v28  ;;  %v1319_v0 = vmul.f32 0.0078125, %v1280_v2  ;;  %2618 = vmatprep.mubr.bf16.mxu0 %v1531_v59  ;;  %v1440_v49 = vmul.f32 %v3843_v29, %v1404_v58 }
 0x472   :  { %v2787_v40 = vpop.eup %2786  ;;  %2800 = vrsqrt.f32 %v1349_v48  ;;  %v1506_v8 = vmax.f32 %v1474_v31, 0.0  ;;  %v1441_v36 = vmul.f32 %v3843_v29, %v1405_v19  ;;  %v1507_v43 = vmax.f32 %v1475_v4, 0.0 }
 0x473   :  { %v2789_v57 = vpop.eup %2788  ;;  %v1350_v60 = vadd.f32 1e-05, %v1318_v5  ;;  %v1351_v12 = vadd.f32 1e-05, %v1319_v0  ;;  %v1476_v13 = vadd.f32 %v3847_v9, %v1440_v49  ;;  %v1406_v35 = vmul.f32 %v2787_v40, %v3756_v7 }
 0x474   :  { %v1282_v24 = vpop.xlane.xlu1 %1281  ;;  %v1284_v45 = vpop.xlane.xlu0 %1283  ;;  %v1532_v21 = vpack.c.bf16 %v1506_v8, %v1505_v17  ;;  %v1407_v34 = vmul.f32 %v2789_v57, %v3759_v51  ;;  %v1477_v27 = vadd.f32 %v3847_v9, %v1441_v36 }
 0x475   :  { %2802 = vrsqrt.f32 %v1350_v60  ;;  %v1320_v56 = vmul.f32 0.0078125, %v1282_v24  ;;  %v1321_v22 = vmul.f32 0.0078125, %v1284_v45  ;;  %v1508_v50 = vmax.f32 %v1476_v13, 0.0 }
 0x476   :  { %v2791_v26 = vpop.eup %2790  ;;  %2804 = vrsqrt.f32 %v1351_v12  ;;  %2619 = vmatmul.mubr.bf16.gmra.mxu0 %v1532_v21  ;;  %v1442_v20 = vmul.f32 %v3843_v29, %v1406_v35  ;;  %v1443_v47 = vmul.f32 %v3843_v29, %v1407_v34  ;;  %v1509_v52 = vmax.f32 %v1477_v27, 0.0 }
 0x477   :  { %v2793_v7 = vpop.eup %2792  ;;  %v1352_v3 = vadd.f32 1e-05, %v1320_v56  ;;  %v1353_v25 = vadd.f32 1e-05, %v1321_v22  ;;  %v1533_v63 = vpack.c.bf16 %v1508_v50, %v1507_v43  ;;  %v1408_v37 = vmul.f32 %v2791_v26, %v3766_v42 }
 0x478   :  { %v1286_v51 = vpop.xlane.xlu1 %1285  ;;  %v1288_v6 = vpop.xlane.xlu0 %1287  ;;  %v1478_v39 = vadd.f32 %v3847_v9, %v1442_v20  ;;  %v1479_v44 = vadd.f32 %v3847_v9, %v1443_v47  ;;  %v1409_v16 = vmul.f32 %v2793_v7, %v3769_v23 }
 0x479   :  { %2806 = vrsqrt.f32 %v1352_v3  ;;  %v1322_v10 = vmul.f32 0.0078125, %v1286_v51  ;;  %v1323_v46 = vmul.f32 0.0078125, %v1288_v6  ;;  %2622 = vmatprep.mubr.bf16.mxu0 %v1533_v63  ;;  %v1444_v38 = vmul.f32 %v3843_v29, %v1408_v37 }
 0x47a   :  { %v2795_v32 = vpop.eup %2794  ;;  %2808 = vrsqrt.f32 %v1353_v25  ;;  %v1510_v48 = vmax.f32 %v1478_v39, 0.0  ;;  %v1445_v42 = vmul.f32 %v3843_v29, %v1409_v16  ;;  %v1511_v5 = vmax.f32 %v1479_v44, 0.0 }
 0x47b   :  { %v2797_v59 = vpop.eup %2796  ;;  %v1354_v58 = vadd.f32 1e-05, %v1322_v10  ;;  %v1355_v28 = vadd.f32 1e-05, %v1323_v46  ;;  %v1480_v2 = vadd.f32 %v3847_v9, %v1444_v38  ;;  %v1410_v31 = vmul.f32 %v2795_v32, %v3776_v54 }
 0x47c   :  { %v1290_v23 = vpop.xlane.xlu1 %1289  ;;  %v1292_v4 = vpop.xlane.xlu0 %1291  ;;  %v1534_v19 = vpack.c.bf16 %v1510_v48, %v1509_v52  ;;  %v1411_v0 = vmul.f32 %v2797_v59, %v3779_v15  ;;  %v1481_v57 = vadd.f32 %v3847_v9, %v1445_v42 }
 0x47d   :  { %2810 = vrsqrt.f32 %v1354_v58  ;;  %v1324_v49 = vmul.f32 0.0078125, %v1290_v23  ;;  %v1325_v40 = vmul.f32 0.0078125, %v1292_v4  ;;  %v1512_v17 = vmax.f32 %v1480_v2, 0.0 }
 0x47e   :  { %v2799_v8 = vpop.eup %2798  ;;  %2812 = vrsqrt.f32 %v1355_v28  ;;  %2623 = vmatmul.mubr.bf16.gmra.mxu0 %v1534_v19  ;;  %v1446_v36 = vmul.f32 %v3843_v29, %v1410_v31  ;;  %v1447_v60 = vmul.f32 %v3843_v29, %v1411_v0  ;;  %v1513_v50 = vmax.f32 %v1481_v57, 0.0 }
 0x47f   :  { %v2801_v54 = vpop.eup %2800  ;;  %v1356_v12 = vadd.f32 1e-05, %v1324_v49  ;;  %v1357_v13 = vadd.f32 1e-05, %v1325_v40  ;;  %v1535_v35 = vpack.c.bf16 %v1512_v17, %v1511_v5  ;;  %v1412_v24 = vmul.f32 %v2799_v8, %v3786_v18 }
 0x480   :  { %v1294_v15 = vpop.xlane.xlu1 %1293  ;;  %v1482_v45 = vadd.f32 %v3847_v9, %v1446_v36  ;;  %v1483_v21 = vadd.f32 %v3847_v9, %v1447_v60  ;;  %v1413_v43 = vmul.f32 %v2801_v54, %v3789_v53 }
 0x481   :  { %2814 = vrsqrt.f32 %v1356_v12  ;;  %v1326_v34 = vmul.f32 0.0078125, %v1294_v15  ;;  %2626 = vmatprep.mubr.bf16.mxu0 %v1535_v35  ;;  %v1448_v56 = vmul.f32 %v3843_v29, %v1412_v24 }
 0x482   :  { %v2803_v22 = vpop.eup %2802  ;;  %2816 = vrsqrt.f32 %v1357_v13  ;;  %v1514_v26 = vmax.f32 %v1482_v45, 0.0  ;;  %v1449_v20 = vmul.f32 %v3843_v29, %v1413_v43  ;;  %v1515_v25 = vmax.f32 %v1483_v21, 0.0 }
 0x483   :  { %v2805_v27 = vpop.eup %2804  ;;  %v1358_v18 = vadd.f32 1e-05, %v1326_v34  ;;  %v1484_v47 = vadd.f32 %v3847_v9, %v1448_v56  ;;  %v1414_v7 = vmul.f32 %v2803_v22, %v3796_v41  ;;  %v3947_v22 = vld [vmem:[%s4248_s5] ss:$0 sm:$0xff]  ;;  %s3086_s5 = smov [#allocation11]  }
 0x484   :  { %v1536_v3 = vpack.c.bf16 %v1514_v26, %v1513_v50  ;;  %v1415_v53 = vmul.f32 %v2805_v27, %v3799_v62  ;;  %v1485_v51 = vadd.f32 %v3847_v9, %v1449_v20  ;;  %s2228_s23 = sshll.u32 %s3086_s5, 4  ;;  %s2229_s23 = int_to_ptr.vmem [resolvable:$true] %s2228_s23 }
 0x485   :  { %2818 = vrsqrt.f32 %v1358_v18  ;;  %v1516_v63 = vmax.f32 %v1484_v47, 0.0  ;;  %v1450_v37 = vmul.f32 %v3843_v29, %v1414_v7  ;;  %s3049_s26 = scalar_lea.vmem %s2229_s23, 2048  ;;  %p3054_p12 = scmp.lt.s32.totalorder %s2229_s23, %s2229_s23 }
 0x486   :  { %v2807_v6 = vpop.eup %2806  ;;  %2627 = vmatmul.mubr.bf16.gmra.mxu0 %v1536_v3  ;;  %v1451_v39 = vmul.f32 %v3843_v29, %v1415_v53  ;;  %v1517_v62 = vmax.f32 %v1485_v51, 0.0  ;;  %p3050_p11 = scmp.ne.s32.totalorder %s2229_s23, %s3049_s26  ;;  %p3055_p13 = scmp.lt.s32.totalorder %s3049_s26, %s3049_s26 }
 0x487   :  { %v2809_v44 = vpop.eup %2808  ;;  %v1537_v16 = vpack.c.bf16 %v1516_v63, %v1515_v25  ;;  %v1486_v10 = vadd.f32 %v3847_v9, %v1450_v37  ;;  %v1416_v41 = vmul.f32 %v2807_v6, %v3806_v33 }
 0x488   :  { %v1417_v46 = vmul.f32 %v2809_v44, %v3809_v30  ;;  %v1487_v52 = vadd.f32 %v3847_v9, %v1451_v39  ;;  %p3056_p0 = por %p3055_p13, %p3054_p12 }
 0x489   :  { %2630 = vmatprep.mubr.bf16.mxu0 %v1537_v16  ;;  %v1518_v38 = vmax.f32 %v1486_v10, 0.0  ;;  %v1452_v32 = vmul.f32 %v3843_v29, %v1416_v41 }
 0x48a   :  { %v2811_v48 = vpop.eup %2810  ;;  %v1453_v42 = vmul.f32 %v3843_v29, %v1417_v46  ;;  %v1519_v31 = vmax.f32 %v1487_v52, 0.0  ;;  %p3057_p1 = pnand %p3056_p0, %p3050_p11 }
 0x48b   :  { %v2813_v59 = vpop.eup %2812  ;;  %v1538_v58 = vpack.c.bf16 %v1518_v38, %v1517_v62  ;;  %v1488_v28 = vadd.f32 %v3847_v9, %v1452_v32  ;;  %v1418_v2 = vmul.f32 %v2811_v48, %v3816_v61 }
 0x48c   :  { %v1419_v33 = vmul.f32 %v2813_v59, %v3819_v55  ;;  %v1489_v4 = vadd.f32 %v3847_v9, %v1453_v42 }
 0x48d   :  { %v1520_v30 = vmax.f32 %v1488_v28, 0.0  ;;  %v1454_v23 = vmul.f32 %v3843_v29, %v1418_v2 }
 0x48e   :  { %v2815_v19 = vpop.eup %2814  ;;  %2631 = vmatmul.mubr.bf16.gmra.mxu0 %v1538_v58  ;;  %v1455_v5 = vmul.f32 %v3843_v29, %v1419_v33  ;;  %v1521_v55 = vmax.f32 %v1489_v4, 0.0 }
 0x48f   :  { %v2817_v0 = vpop.eup %2816  ;;  %v1539_v49 = vpack.c.bf16 %v1520_v30, %v1519_v31  ;;  %v1490_v40 = vadd.f32 %v3847_v9, %v1454_v23  ;;  %v1420_v17 = vmul.f32 %v2815_v19, %v3826_v14 }
 0x490   :  { %v1421_v61 = vmul.f32 %v2817_v0, %v3829_v11  ;;  %v1491_v57 = vadd.f32 %v3847_v9, %v1455_v5 }
 0x491   :  { %2634 = vmatprep.mubr.bf16.mxu0 %v1539_v49  ;;  %v1522_v8 = vmax.f32 %v1490_v40, 0.0  ;;  %v1456_v36 = vmul.f32 %v3843_v29, %v1420_v17 }
 0x492   :  { %v2819_v60 = vpop.eup %2818  ;;  %v1457_v54 = vmul.f32 %v3843_v29, %v1421_v61  ;;  %v1523_v24 = vmax.f32 %v1491_v57, 0.0 }
 0x493   :  { %v1540_v12 = vpack.c.bf16 %v1522_v8, %v1521_v55  ;;  %v1492_v13 = vadd.f32 %v3847_v9, %v1456_v36  ;;  %v1422_v35 = vmul.f32 %v2819_v60, %v3836_v1 }
 0x494   :  { %v1493_v11 = vadd.f32 %v3847_v9, %v1457_v54 }
 0x495   :  { %v1524_v15 = vmax.f32 %v1492_v13, 0.0  ;;  %v1458_v14 = vmul.f32 %v3843_v29, %v1422_v35 }
 0x496   :  { %2635 = vmatmul.mubr.bf16.gmra.mxu0 %v1540_v12  ;;  %v1525_v43 = vmax.f32 %v1493_v11, 0.0 }
 0x497   :  { %v1541_v45 = vpack.c.bf16 %v1524_v15, %v1523_v24  ;;  %v1494_v21 = vadd.f32 %v3847_v9, %v1458_v14 }
 0x499   :  { %2638 = vmatprep.mubr.bf16.mxu0 %v1541_v45  ;;  %v1526_v34 = vmax.f32 %v1494_v21, 0.0 }
 0x49b   :  { %v1542_v56 = vpack.c.bf16 %v1526_v34, %v1525_v43 }
 0x49e   :  { %2639 = vmatmul.mubr.bf16.gmra.mxu0 %v1542_v56 }
 0x526   :  { %v2612_v1 = vpop.f32.mrf.mxu0 }
 0x527   :  { %v3950_v50 = vadd.f32 %v2612_v1, %v3947_v22 }
 0x528   :  { %v1648_v29 = vpop.f32.mrf.mxu0 }
 0x529   :  { %1779 = vmax.xlane.f32.xlu0 %v3950_v50  ;;  %v3954_v9 = vadd.f32 %v3947_v22, %v1648_v29 }
 0x52a   :  { %v2613_v26 = vpop.f32.mrf.mxu0 }
 0x52b   :  { %v3957_v20 = vadd.f32 %v2613_v26, %v3947_v22 }
 0x52c   :  { %v1651_v27 = vpop.f32.mrf.mxu0 }
 0x52d   :  { %1781 = vmax.xlane.f32.xlu1 %v3957_v20  ;;  %1775 = vmax.xlane.f32.xlu0 %v3954_v9  ;;  %v3962_v47 = vadd.f32 %v3947_v22, %v1651_v27 }
 0x52e   :  { %v2616_v18 = vpop.f32.mrf.mxu0 }
 0x52f   :  { %v3965_v7 = vadd.f32 %v2616_v18, %v3947_v22 }
 0x530   :  { %v1664_v3 = vpop.f32.mrf.mxu0 }
 0x531   :  { %1777 = vmax.xlane.f32.xlu1 %v3962_v47  ;;  %1787 = vmax.xlane.f32.xlu0 %v3965_v7  ;;  %v3970_v53 = vadd.f32 %v3947_v22, %v1664_v3 }
 0x532   :  { %v2617_v25 = vpop.f32.mrf.mxu0 }
 0x533   :  { %v3973_v63 = vadd.f32 %v2617_v25, %v3947_v22 }
 0x534   :  { %v1667_v37 = vpop.f32.mrf.mxu0 }
 0x535   :  { %1789 = vmax.xlane.f32.xlu1 %v3973_v63  ;;  %1783 = vmax.xlane.f32.xlu0 %v3970_v53  ;;  %v3978_v6 = vadd.f32 %v3947_v22, %v1667_v37 }
 0x536   :  { %v2620_v51 = vpop.f32.mrf.mxu0 }
 0x537   :  { %v3981_v39 = vadd.f32 %v2620_v51, %v3947_v22 }
 0x538   :  { %v1680_v44 = vpop.f32.mrf.mxu0 }
 0x539   :  { %1785 = vmax.xlane.f32.xlu1 %v3978_v6  ;;  %1795 = vmax.xlane.f32.xlu0 %v3981_v39  ;;  %v3986_v10 = vadd.f32 %v3947_v22, %v1680_v44 }
 0x53a   :  { %v2621_v16 = vpop.f32.mrf.mxu0 }
 0x53b   :  { %v3989_v41 = vadd.f32 %v2621_v16, %v3947_v22 }
 0x53c   :  { %v1683_v46 = vpop.f32.mrf.mxu0 }
 0x53d   :  { %1797 = vmax.xlane.f32.xlu1 %v3989_v41  ;;  %1791 = vmax.xlane.f32.xlu0 %v3986_v10  ;;  %v3994_v38 = vadd.f32 %v3947_v22, %v1683_v46 }
 0x53e   :  { %v2624_v62 = vpop.f32.mrf.mxu0 }
 0x53f   :  { %v3997_v32 = vadd.f32 %v2624_v62, %v3947_v22 }
 0x540   :  { %v1696_v52 = vpop.f32.mrf.mxu0 }
 0x541   :  { %1793 = vmax.xlane.f32.xlu1 %v3994_v38  ;;  %1803 = vmax.xlane.f32.xlu0 %v3997_v32  ;;  %v4002_v42 = vadd.f32 %v3947_v22, %v1696_v52 }
 0x542   :  { %v2625_v48 = vpop.f32.mrf.mxu0 }
 0x543   :  { %v4005_v59 = vadd.f32 %v2625_v48, %v3947_v22 }
 0x544   :  { %v1699_v58 = vpop.f32.mrf.mxu0 }
 0x545   :  { %1805 = vmax.xlane.f32.xlu1 %v4005_v59  ;;  %1799 = vmax.xlane.f32.xlu0 %v4002_v42  ;;  %v4010_v2 = vadd.f32 %v3947_v22, %v1699_v58 }
 0x546   :  { %v2628_v28 = vpop.f32.mrf.mxu0 }
 0x547   :  { %v4013_v33 = vadd.f32 %v2628_v28, %v3947_v22 }
 0x548   :  { %v1712_v31 = vpop.f32.mrf.mxu0 }
 0x549   :  { %1801 = vmax.xlane.f32.xlu1 %v4010_v2  ;;  %1811 = vmax.xlane.f32.xlu0 %v4013_v33  ;;  %v4018_v23 = vadd.f32 %v3947_v22, %v1712_v31 }
 0x54a   :  { %v2629_v30 = vpop.f32.mrf.mxu0 }
 0x54b   :  { %v4021_v4 = vadd.f32 %v2629_v30, %v3947_v22 }
 0x54c   :  { %v1715_v19 = vpop.f32.mrf.mxu0 }
 0x54d   :  { %1813 = vmax.xlane.f32.xlu1 %v4021_v4  ;;  %1807 = vmax.xlane.f32.xlu0 %v4018_v23  ;;  %v4026_v0 = vadd.f32 %v3947_v22, %v1715_v19 }
 0x54e   :  { %v2632_v5 = vpop.f32.mrf.mxu0 }
 0x54f   :  { %v4029_v49 = vadd.f32 %v2632_v5, %v3947_v22 }
 0x550   :  { %v1728_v40 = vpop.f32.mrf.mxu0 }
 0x551   :  { %1809 = vmax.xlane.f32.xlu1 %v4026_v0  ;;  %1819 = vmax.xlane.f32.xlu0 %v4029_v49  ;;  %v4034_v61 = vadd.f32 %v3947_v22, %v1728_v40 }
 0x552   :  { %v2633_v17 = vpop.f32.mrf.mxu0 }
 0x553   :  { %v4037_v55 = vadd.f32 %v2633_v17, %v3947_v22 }
 0x554   :  { %v1731_v8 = vpop.f32.mrf.mxu0 }
 0x555   :  { %1821 = vmax.xlane.f32.xlu1 %v4037_v55  ;;  %1815 = vmax.xlane.f32.xlu0 %v4034_v61  ;;  %v4042_v57 = vadd.f32 %v3947_v22, %v1731_v8 }
 0x556   :  { %v2636_v36 = vpop.f32.mrf.mxu0 }
 0x557   :  { %v4045_v60 = vadd.f32 %v2636_v36, %v3947_v22 }
 0x558   :  { %v1744_v54 = vpop.f32.mrf.mxu0 }
 0x559   :  { %1817 = vmax.xlane.f32.xlu1 %v4042_v57  ;;  %1827 = vmax.xlane.f32.xlu0 %v4045_v60  ;;  %v4050_v13 = vadd.f32 %v3947_v22, %v1744_v54 }
 0x55a   :  { %v2637_v12 = vpop.f32.mrf.mxu0 }
 0x55b   :  { %v4053_v35 = vadd.f32 %v2637_v12, %v3947_v22 }
 0x55c   :  { %v1747_v24 = vpop.f32.mrf.mxu0 }
 0x55d   :  { %1829 = vmax.xlane.f32.xlu1 %v4053_v35  ;;  %1823 = vmax.xlane.f32.xlu0 %v4050_v13  ;;  %v4058_v14 = vadd.f32 %v3947_v22, %v1747_v24 }
 0x55e   :  { %v2640_v15 = vpop.f32.mrf.mxu0 }
 0x55f   :  { %v4066_v34 = vadd.f32 %v2640_v15, %v3947_v22 }
 0x560   :  { %v1760_v11 = vpop.f32.mrf.mxu0 }
 0x561   :  { %v4061_v45 = vadd.f32 %v3947_v22, %v1760_v11  ;;  %1825 = vmax.xlane.f32.xlu1 %v4058_v14 }
 0x562   :  { %v2641_v21 = vpop.f32.mrf.mxu0 }
 0x563   :  { %1831 = vmax.xlane.f32.xlu0 %v4061_v45  ;;  %v4074_v1 = vadd.f32 %v2641_v21, %v3947_v22 }
 0x564   :  { %v1763_v43 = vpop.f32.mrf.mxu0 }
 0x565   :  { %v4069_v56 = vadd.f32 %v3947_v22, %v1763_v43 }
 0x567   :  { %1833 = vmax.xlane.f32.xlu1 %v4069_v56  ;;  %1835 = vmax.xlane.f32.xlu0 %v4066_v34 }
 0x56b   :  { %1837 = vmax.xlane.f32.xlu1 %v4074_v1 }
 0x5b2   :  { %v1780_v29 = vpop.xlane.xlu0 %1779 }
 0x5b3   :  { %v1841_v26 = vsub.f32 %v3950_v50, %v1780_v29 }
 0x5b5   :  { %v1875_v27 = vmul.f32 1.442695, %v1841_v26 }
 0x5b6   :  { %v1782_v18 = vpop.xlane.xlu1 %1781  ;;  %v1776_v3 = vpop.xlane.xlu0 %1775 }
 0x5b7   :  { %2820 = vpow2.f32 %v1875_v27  ;;  %v1842_v25 = vsub.f32 %v3957_v20, %v1782_v18  ;;  %v1839_v37 = vsub.f32 %v3954_v9, %v1776_v3 }
 0x5b9   :  { %v1877_v51 = vmul.f32 1.442695, %v1842_v25  ;;  %v1871_v44 = vmul.f32 1.442695, %v1839_v37 }
 0x5ba   :  { %v1778_v16 = vpop.xlane.xlu1 %1777  ;;  %v1788_v46 = vpop.xlane.xlu0 %1787 }
 0x5bb   :  { %2822 = vpow2.f32 %v1877_v51  ;;  %v1840_v22 = vsub.f32 %v3962_v47, %v1778_v16  ;;  %v1845_v62 = vsub.f32 %v3965_v7, %v1788_v46 }
 0x5bc   :  { %2824 = vpow2.f32 %v1871_v44 }
 0x5bd   :  { %v1873_v52 = vmul.f32 1.442695, %v1840_v22  ;;  %v1883_v50 = vmul.f32 1.442695, %v1845_v62 }
 0x5be   :  { %v1790_v48 = vpop.xlane.xlu1 %1789  ;;  %v1784_v58 = vpop.xlane.xlu0 %1783 }
 0x5bf   :  { %2826 = vpow2.f32 %v1873_v52  ;;  %v1846_v28 = vsub.f32 %v3973_v63, %v1790_v48  ;;  %v1843_v20 = vsub.f32 %v3970_v53, %v1784_v58 }
 0x5c0   :  { %2828 = vpow2.f32 %v1883_v50 }
 0x5c1   :  { %v1885_v9 = vmul.f32 1.442695, %v1846_v28  ;;  %v1879_v31 = vmul.f32 1.442695, %v1843_v20 }
 0x5c2   :  { %v1786_v30 = vpop.xlane.xlu1 %1785  ;;  %v1796_v19 = vpop.xlane.xlu0 %1795 }
 0x5c3   :  { %2830 = vpow2.f32 %v1885_v9  ;;  %v1844_v47 = vsub.f32 %v3978_v6, %v1786_v30  ;;  %v1849_v7 = vsub.f32 %v3981_v39, %v1796_v19 }
 0x5c4   :  { %v4086_v5 = vpop.eup %2820  ;;  %2832 = vpow2.f32 %v1879_v31 }
 0x5c5   :  { %v1881_v40 = vmul.f32 1.442695, %v1844_v47  ;;  %v1891_v17 = vmul.f32 1.442695, %v1849_v7  ;;  %1939 = vadd.xlane.f32.xlu0 %v4086_v5 }
 0x5c6   :  { %v1798_v63 = vpop.xlane.xlu1 %1797  ;;  %v1792_v8 = vpop.xlane.xlu0 %1791 }
 0x5c7   :  { %2834 = vpow2.f32 %v1881_v40  ;;  %v1850_v53 = vsub.f32 %v3989_v41, %v1798_v63  ;;  %v1847_v36 = vsub.f32 %v3986_v10, %v1792_v8 }
 0x5c8   :  { %v4091_v54 = vpop.eup %2822  ;;  %2836 = vpow2.f32 %v1891_v17 }
 0x5c9   :  { %v4093_v6 = vpop.eup %2824  ;;  %v1893_v39 = vmul.f32 1.442695, %v1850_v53  ;;  %v1887_v12 = vmul.f32 1.442695, %v1847_v36  ;;  %1941 = vadd.xlane.f32.xlu1 %v4091_v54 }
 0x5ca   :  { %1935 = vadd.xlane.f32.xlu0 %v4093_v6  ;;  %v1794_v24 = vpop.xlane.xlu1 %1793  ;;  %v1804_v15 = vpop.xlane.xlu0 %1803 }
 0x5cb   :  { %2838 = vpow2.f32 %v1893_v39  ;;  %v1848_v11 = vsub.f32 %v3994_v38, %v1794_v24  ;;  %v1853_v41 = vsub.f32 %v3997_v32, %v1804_v15 }
 0x5cc   :  { %v4099_v21 = vpop.eup %2826  ;;  %2840 = vpow2.f32 %v1887_v12 }
 0x5cd   :  { %v4101_v10 = vpop.eup %2828  ;;  %v1889_v43 = vmul.f32 1.442695, %v1848_v11  ;;  %v1899_v29 = vmul.f32 1.442695, %v1853_v41  ;;  %1937 = vadd.xlane.f32.xlu1 %v4099_v21 }
 0x5ce   :  { %1947 = vadd.xlane.f32.xlu0 %v4101_v10  ;;  %v1806_v26 = vpop.xlane.xlu1 %1805  ;;  %v1800_v27 = vpop.xlane.xlu0 %1799 }
 0x5cf   :  { %2842 = vpow2.f32 %v1889_v43  ;;  %v1854_v18 = vsub.f32 %v4005_v59, %v1806_v26  ;;  %v1851_v38 = vsub.f32 %v4002_v42, %v1800_v27 }
 0x5d0   :  { %v4107_v3 = vpop.eup %2830  ;;  %2844 = vpow2.f32 %v1899_v29 }
 0x5d1   :  { %v4109_v32 = vpop.eup %2832  ;;  %v1901_v25 = vmul.f32 1.442695, %v1854_v18  ;;  %v1895_v37 = vmul.f32 1.442695, %v1851_v38  ;;  %1949 = vadd.xlane.f32.xlu1 %v4107_v3 }
 0x5d2   :  { %1943 = vadd.xlane.f32.xlu0 %v4109_v32  ;;  %v1802_v51 = vpop.xlane.xlu1 %1801  ;;  %v1812_v44 = vpop.xlane.xlu0 %1811 }
 0x5d3   :  { %2846 = vpow2.f32 %v1901_v25  ;;  %v1852_v16 = vsub.f32 %v4010_v2, %v1802_v51  ;;  %v1857_v59 = vsub.f32 %v4013_v33, %v1812_v44 }
 0x5d4   :  { %v4115_v46 = vpop.eup %2834  ;;  %2848 = vpow2.f32 %v1895_v37 }
 0x5d5   :  { %v4117_v42 = vpop.eup %2836  ;;  %v1897_v22 = vmul.f32 1.442695, %v1852_v16  ;;  %v1907_v62 = vmul.f32 1.442695, %v1857_v59  ;;  %1945 = vadd.xlane.f32.xlu1 %v4115_v46 }
 0x5d6   :  { %1955 = vadd.xlane.f32.xlu0 %v4117_v42  ;;  %v1814_v52 = vpop.xlane.xlu1 %1813  ;;  %v1808_v50 = vpop.xlane.xlu0 %1807 }
 0x5d7   :  { %2850 = vpow2.f32 %v1897_v22  ;;  %v1858_v48 = vsub.f32 %v4021_v4, %v1814_v52  ;;  %v1855_v2 = vsub.f32 %v4018_v23, %v1808_v50 }
 0x5d8   :  { %v4123_v58 = vpop.eup %2838  ;;  %2852 = vpow2.f32 %v1907_v62 }
 0x5d9   :  { %v4125_v33 = vpop.eup %2840  ;;  %v1909_v28 = vmul.f32 1.442695, %v1858_v48  ;;  %v1903_v20 = vmul.f32 1.442695, %v1855_v2  ;;  %1957 = vadd.xlane.f32.xlu1 %v4123_v58 }
 0x5da   :  { %1951 = vadd.xlane.f32.xlu0 %v4125_v33  ;;  %v1810_v9 = vpop.xlane.xlu1 %1809  ;;  %v1820_v31 = vpop.xlane.xlu0 %1819 }
 0x5db   :  { %2854 = vpow2.f32 %v1909_v28  ;;  %v1856_v30 = vsub.f32 %v4026_v0, %v1810_v9  ;;  %v1861_v4 = vsub.f32 %v4029_v49, %v1820_v31 }
 0x5dc   :  { %v4131_v19 = vpop.eup %2842  ;;  %2856 = vpow2.f32 %v1903_v20 }
 0x5dd   :  { %v4133_v23 = vpop.eup %2844  ;;  %v1905_v47 = vmul.f32 1.442695, %v1856_v30  ;;  %v1915_v7 = vmul.f32 1.442695, %v1861_v4  ;;  %1953 = vadd.xlane.f32.xlu1 %v4131_v19 }
 0x5de   :  { %1963 = vadd.xlane.f32.xlu0 %v4133_v23  ;;  %v1822_v40 = vpop.xlane.xlu1 %1821  ;;  %v1816_v17 = vpop.xlane.xlu0 %1815 }
 0x5df   :  { %2858 = vpow2.f32 %v1905_v47  ;;  %v1862_v63 = vsub.f32 %v4037_v55, %v1822_v40  ;;  %v1859_v0 = vsub.f32 %v4034_v61, %v1816_v17 }
 0x5e0   :  { %v4139_v8 = vpop.eup %2846  ;;  %2860 = vpow2.f32 %v1915_v7 }
 0x5e1   :  { %v4141_v49 = vpop.eup %2848  ;;  %v1917_v53 = vmul.f32 1.442695, %v1862_v63  ;;  %v1911_v36 = vmul.f32 1.442695, %v1859_v0  ;;  %1965 = vadd.xlane.f32.xlu1 %v4139_v8 }
 0x5e2   :  { %1959 = vadd.xlane.f32.xlu0 %v4141_v49  ;;  %v1818_v39 = vpop.xlane.xlu1 %1817  ;;  %v1828_v12 = vpop.xlane.xlu0 %1827 }
 0x5e3   :  { %2862 = vpow2.f32 %v1917_v53  ;;  %v1860_v24 = vsub.f32 %v4042_v57, %v1818_v39  ;;  %v1865_v55 = vsub.f32 %v4045_v60, %v1828_v12 }
 0x5e4   :  { %v4147_v15 = vpop.eup %2850  ;;  %2864 = vpow2.f32 %v1911_v36 }
 0x5e5   :  { %v4149_v61 = vpop.eup %2852  ;;  %v1913_v11 = vmul.f32 1.442695, %v1860_v24  ;;  %v1923_v41 = vmul.f32 1.442695, %v1865_v55  ;;  %1961 = vadd.xlane.f32.xlu1 %v4147_v15 }
 0x5e6   :  { %1971 = vadd.xlane.f32.xlu0 %v4149_v61  ;;  %v1830_v43 = vpop.xlane.xlu1 %1829  ;;  %v1824_v29 = vpop.xlane.xlu0 %1823 }
 0x5e7   :  { %2866 = vpow2.f32 %v1913_v11  ;;  %v1866_v26 = vsub.f32 %v4053_v35, %v1830_v43  ;;  %v1863_v57 = vsub.f32 %v4050_v13, %v1824_v29 }
 0x5e8   :  { %v4155_v27 = vpop.eup %2854  ;;  %2868 = vpow2.f32 %v1923_v41 }
 0x5e9   :  { %v4157_v60 = vpop.eup %2856  ;;  %v1925_v18 = vmul.f32 1.442695, %v1866_v26  ;;  %v1919_v38 = vmul.f32 1.442695, %v1863_v57  ;;  %1973 = vadd.xlane.f32.xlu1 %v4155_v27 }
 0x5ea   :  { %1967 = vadd.xlane.f32.xlu0 %v4157_v60  ;;  %v1826_v25 = vpop.xlane.xlu1 %1825 }
 0x5eb   :  { %2870 = vpow2.f32 %v1925_v18  ;;  %v1864_v37 = vsub.f32 %v4058_v14, %v1826_v25 }
 0x5ec   :  { %v4162_v51 = vpop.eup %2858  ;;  %2872 = vpow2.f32 %v1919_v38  ;;  %v1832_v35 = vpop.xlane.xlu0 %1831 }
 0x5ed   :  { %v4164_v13 = vpop.eup %2860  ;;  %v1921_v44 = vmul.f32 1.442695, %v1864_v37  ;;  %v1867_v16 = vsub.f32 %v4061_v45, %v1832_v35  ;;  %1969 = vadd.xlane.f32.xlu1 %v4162_v51 }
 0x5ee   :  { %1979 = vadd.xlane.f32.xlu0 %v4164_v13 }
 0x5ef   :  { %2874 = vpow2.f32 %v1921_v44  ;;  %v1927_v59 = vmul.f32 1.442695, %v1867_v16 }
 0x5f0   :  { %v4169_v22 = vpop.eup %2862  ;;  %v1834_v62 = vpop.xlane.xlu1 %1833 }
 0x5f1   :  { %v1836_v52 = vpop.xlane.xlu0 %1835  ;;  %v4171_v14 = vpop.eup %2864  ;;  %2876 = vpow2.f32 %v1927_v59  ;;  %v1868_v50 = vsub.f32 %v4069_v56, %v1834_v62  ;;  %1981 = vadd.xlane.f32.xlu1 %v4169_v22 }
 0x5f2   :  { %v1869_v48 = vsub.f32 %v4066_v34, %v1836_v52  ;;  %1975 = vadd.xlane.f32.xlu0 %v4171_v14 }
 0x5f3   :  { %v1929_v45 = vmul.f32 1.442695, %v1868_v50 }
 0x5f4   :  { %v1931_v2 = vmul.f32 1.442695, %v1869_v48  ;;  %v4177_v28 = vpop.eup %2866  ;;  %v1838_v20 = vpop.xlane.xlu1 %1837 }
 0x5f5   :  { %v4179_v9 = vpop.eup %2868  ;;  %2878 = vpow2.f32 %v1929_v45  ;;  %v1870_v31 = vsub.f32 %v4074_v1, %v1838_v20  ;;  %1977 = vadd.xlane.f32.xlu1 %v4177_v28 }
 0x5f6   :  { %2880 = vpow2.f32 %v1931_v2  ;;  %1987 = vadd.xlane.f32.xlu0 %v4179_v9 }
 0x5f7   :  { %v1933_v34 = vmul.f32 1.442695, %v1870_v31 }
 0x5f8   :  { %v4184_v56 = vpop.eup %2870 }
 0x5f9   :  { %v4186_v30 = vpop.eup %2872  ;;  %2882 = vpow2.f32 %v1933_v34  ;;  %1989 = vadd.xlane.f32.xlu1 %v4184_v56 }
 0x5fa   :  { %1983 = vadd.xlane.f32.xlu0 %v4186_v30 }
 0x5fc   :  { %v4190_v4 = vpop.eup %2874 }
 0x5fd   :  { %1985 = vadd.xlane.f32.xlu1 %v4190_v4 }
 0x5fe   :  { %v4193_v1 = vpop.eup %2876 }
 0x5ff   :  { %1991 = vadd.xlane.f32.xlu0 %v4193_v1 }
 0x602   :  { %v4196_v47 = vpop.eup %2878 }
 0x603   :  { %v4198_v7 = vpop.eup %2880  ;;  %1993 = vadd.xlane.f32.xlu1 %v4196_v47 }
 0x604   :  { %1995 = vadd.xlane.f32.xlu0 %v4198_v7 }
 0x606   :  { %v4202_v40 = vpop.eup %2882 }
 0x607   :  { %1997 = vadd.xlane.f32.xlu1 %v4202_v40 }
 0x64e   :  { %v1940_v17 = vpop.xlane.xlu0 %1939 }
 0x64f   :  { %2884 = vrcp.f32 %v1940_v17 }
 0x652   :  { %v1942_v63 = vpop.xlane.xlu1 %1941 }
 0x653   :  { %2886 = vrcp.f32 %v1942_v63  ;;  %v1936_v0 = vpop.xlane.xlu0 %1935 }
 0x654   :  { %2888 = vrcp.f32 %v1936_v0 }
 0x656   :  { %v1938_v53 = vpop.xlane.xlu1 %1937 }
 0x657   :  { %2890 = vrcp.f32 %v1938_v53  ;;  %v1948_v36 = vpop.xlane.xlu0 %1947 }
 0x658   :  { %2892 = vrcp.f32 %v1948_v36 }
 0x65a   :  { %v1950_v39 = vpop.xlane.xlu1 %1949 }
 0x65b   :  { %2894 = vrcp.f32 %v1950_v39  ;;  %v1944_v12 = vpop.xlane.xlu0 %1943 }
 0x65c   :  { %2896 = vrcp.f32 %v1944_v12  ;;  %v2885_v24 = vpop.eup %2884 }
 0x65d   :  { %v2004_v43 = vmul.f32 %v2885_v24, %v4086_v5 }
 0x65e   :  { %v1946_v55 = vpop.xlane.xlu1 %1945 }
 0x65f   :  { %2898 = vrcp.f32 %v1946_v55  ;;  %v1956_v11 = vpop.xlane.xlu0 %1955 }
 0x660   :  { %v2887_v41 = vpop.eup %2886  ;;  %2900 = vrcp.f32 %v1956_v11 }
 0x661   :  { %v2006_v29 = vmul.f32 %v2887_v41, %v4091_v54  ;;  %v2889_v26 = vpop.eup %2888 }
 0x662   :  { %v1958_v57 = vpop.xlane.xlu1 %1957  ;;  %v2000_v37 = vmul.f32 %v2889_v26, %v4093_v6 }
 0x663   :  { %v2339_v18 = vpack.c.bf16 %v2006_v29, %v2004_v43  ;;  %2902 = vrcp.f32 %v1958_v57  ;;  %v1952_v38 = vpop.xlane.xlu0 %1951 }
 0x664   :  { %v2891_v25 = vpop.eup %2890  ;;  %2904 = vrcp.f32 %v1952_v38 }
 0x665   :  { %2411 = vst [vmem:[#allocation11 + $0x8] sm:$0xff] %v2339_v18   ;;  %v2002_v35 = vmul.f32 %v2891_v25, %v4099_v21  ;;  %v2893_v44 = vpop.eup %2892 }
 0x666   :  { %v1954_v16 = vpop.xlane.xlu1 %1953  ;;  %v2012_v54 = vmul.f32 %v2893_v44, %v4101_v10 }
 0x667   :  { %v2334_v59 = vpack.c.bf16 %v2002_v35, %v2000_v37  ;;  %2906 = vrcp.f32 %v1954_v16  ;;  %v1964_v5 = vpop.xlane.xlu0 %1963 }
 0x668   :  { %v2895_v62 = vpop.eup %2894  ;;  %2908 = vrcp.f32 %v1964_v5 }
 0x669   :  { %2335 = vst [vmem:[#allocation11] sm:$0xff] %v2334_v59   ;;  %v2014_v52 = vmul.f32 %v2895_v62, %v4107_v3  ;;  %v2897_v50 = vpop.eup %2896 }
 0x66a   :  { %v1966_v48 = vpop.xlane.xlu1 %1965  ;;  %v2008_v21 = vmul.f32 %v2897_v50, %v4109_v32 }
 0x66b   :  { %v2349_v45 = vpack.c.bf16 %v2014_v52, %v2012_v54  ;;  %2910 = vrcp.f32 %v1966_v48  ;;  %v1960_v6 = vpop.xlane.xlu0 %1959 }
 0x66c   :  { %v2899_v2 = vpop.eup %2898  ;;  %2912 = vrcp.f32 %v1960_v6 }
 0x66d   :  { %2413 = vst [vmem:[#allocation11 + $0x18] sm:$0xff] %v2349_v45   ;;  %v2010_v20 = vmul.f32 %v2899_v2, %v4115_v46  ;;  %v2901_v31 = vpop.eup %2900 }
 0x66e   :  { %v1962_v34 = vpop.xlane.xlu1 %1961  ;;  %v2020_v3 = vmul.f32 %v2901_v31, %v4117_v42 }
 0x66f   :  { %v2344_v17 = vpack.c.bf16 %v2010_v20, %v2008_v21  ;;  %2914 = vrcp.f32 %v1962_v34  ;;  %v1972_v10 = vpop.xlane.xlu0 %1971 }
 0x670   :  { %v2903_v63 = vpop.eup %2902  ;;  %2916 = vrcp.f32 %v1972_v10 }
 0x671   :  { %2412 = vst [vmem:[#allocation11 + $0x10] sm:$0xff] %v2344_v17   ;;  %v2022_v0 = vmul.f32 %v2903_v63, %v4123_v58  ;;  %v2905_v53 = vpop.eup %2904 }
 0x672   :  { %v1974_v36 = vpop.xlane.xlu1 %1973  ;;  %v2016_v46 = vmul.f32 %v2905_v53, %v4125_v33 }
 0x673   :  { %v2359_v39 = vpack.c.bf16 %v2022_v0, %v2020_v3  ;;  %2918 = vrcp.f32 %v1974_v36  ;;  %v1968_v32 = vpop.xlane.xlu0 %1967 }
 0x674   :  { %v2907_v12 = vpop.eup %2906  ;;  %2920 = vrcp.f32 %v1968_v32 }
 0x675   :  { %2415 = vst [vmem:[#allocation11 + $0x28] sm:$0xff] %v2359_v39   ;;  %v2018_v24 = vmul.f32 %v2907_v12, %v4131_v19  ;;  %v2909_v55 = vpop.eup %2908 }
 0x676   :  { %v1970_v11 = vpop.xlane.xlu1 %1969  ;;  %v2028_v58 = vmul.f32 %v2909_v55, %v4133_v23 }
 0x677   :  { %v2354_v41 = vpack.c.bf16 %v2018_v24, %v2016_v46  ;;  %2922 = vrcp.f32 %v1970_v11  ;;  %v1980_v42 = vpop.xlane.xlu0 %1979 }
 0x678   :  { %v2911_v43 = vpop.eup %2910  ;;  %2924 = vrcp.f32 %v1980_v42 }
 0x679   :  { %2414 = vst [vmem:[#allocation11 + $0x20] sm:$0xff] %v2354_v41   ;;  %v2030_v29 = vmul.f32 %v2911_v43, %v4139_v8  ;;  %v2913_v26 = vpop.eup %2912 }
 0x67a   :  { %v1982_v57 = vpop.xlane.xlu1 %1981  ;;  %v2024_v19 = vmul.f32 %v2913_v26, %v4141_v49 }
 0x67b   :  { %v2369_v18 = vpack.c.bf16 %v2030_v29, %v2028_v58  ;;  %2926 = vrcp.f32 %v1982_v57  ;;  %v1976_v33 = vpop.xlane.xlu0 %1975 }
 0x67c   :  { %v2915_v38 = vpop.eup %2914  ;;  %2928 = vrcp.f32 %v1976_v33 }
 0x67d   :  { %2417 = vst [vmem:[#allocation11 + $0x38] sm:$0xff] %v2369_v18   ;;  %v2026_v25 = vmul.f32 %v2915_v38, %v4147_v15  ;;  %v2917_v37 = vpop.eup %2916 }
 0x67e   :  { %v1978_v35 = vpop.xlane.xlu1 %1977  ;;  %v2036_v8 = vmul.f32 %v2917_v37, %v4149_v61 }
 0x67f   :  { %v2364_v44 = vpack.c.bf16 %v2026_v25, %v2024_v19  ;;  %2930 = vrcp.f32 %v1978_v35  ;;  %v1988_v23 = vpop.xlane.xlu0 %1987 }
 0x680   :  { %v2919_v16 = vpop.eup %2918  ;;  %2932 = vrcp.f32 %v1988_v23 }
 0x681   :  { %2416 = vst [vmem:[#allocation11 + $0x30] sm:$0xff] %v2364_v44   ;;  %v2038_v59 = vmul.f32 %v2919_v16, %v4155_v27  ;;  %v2921_v5 = vpop.eup %2920 }
 0x682   :  { %v1990_v62 = vpop.xlane.xlu1 %1989  ;;  %v2032_v15 = vmul.f32 %v2921_v5, %v4157_v60 }
 0x683   :  { %v2379_v54 = vpack.c.bf16 %v2038_v59, %v2036_v8  ;;  %2934 = vrcp.f32 %v1990_v62  ;;  %v1984_v49 = vpop.xlane.xlu0 %1983 }
 0x684   :  { %v2923_v52 = vpop.eup %2922  ;;  %2936 = vrcp.f32 %v1984_v49 }
 0x685   :  { %2419 = vst [vmem:[#allocation11 + $0x48] sm:$0xff] %v2379_v54   ;;  %v2034_v50 = vmul.f32 %v2923_v52, %v4162_v51  ;;  %v2925_v48 = vpop.eup %2924 }
 0x686   :  { %v1986_v45 = vpop.xlane.xlu1 %1985  ;;  %v2044_v27 = vmul.f32 %v2925_v48, %v4164_v13 }
 0x687   :  { %v2374_v6 = vpack.c.bf16 %v2034_v50, %v2032_v15  ;;  %2938 = vrcp.f32 %v1986_v45 }
 0x688   :  { %v2927_v61 = vpop.eup %2926  ;;  %v1992_v2 = vpop.xlane.xlu0 %1991 }
 0x689   :  { %2418 = vst [vmem:[#allocation11 + $0x40] sm:$0xff] %v2374_v6   ;;  %v2046_v21 = vmul.f32 %v2927_v61, %v4169_v22  ;;  %v2929_v20 = vpop.eup %2928  ;;  %2940 = vrcp.f32 %v1992_v2 }
 0x68a   :  { %v2040_v60 = vmul.f32 %v2929_v20, %v4171_v14 }
 0x68b   :  { %v2389_v31 = vpack.c.bf16 %v2046_v21, %v2044_v27 }
 0x68c   :  { %v2931_v34 = vpop.eup %2930  ;;  %v1994_v17 = vpop.xlane.xlu1 %1993 }
 0x68d   :  { %2421 = vst [vmem:[#allocation11 + $0x58] sm:$0xff] %v2389_v31   ;;  %v2042_v51 = vmul.f32 %v2931_v34, %v4177_v28  ;;  %2942 = vrcp.f32 %v1994_v17  ;;  %v1996_v10 = vpop.xlane.xlu0 %1995  ;;  %v2933_v63 = vpop.eup %2932 }
 0x68e   :  { %2944 = vrcp.f32 %v1996_v10  ;;  %v2052_v13 = vmul.f32 %v2933_v63, %v4179_v9 }
 0x68f   :  { %v2384_v3 = vpack.c.bf16 %v2042_v51, %v2040_v60 }
 0x690   :  { %v2935_v0 = vpop.eup %2934  ;;  %v1998_v53 = vpop.xlane.xlu1 %1997 }
 0x691   :  { %2420 = vst [vmem:[#allocation11 + $0x50] sm:$0xff] %v2384_v3   ;;  %v2054_v22 = vmul.f32 %v2935_v0, %v4184_v56  ;;  %2946 = vrcp.f32 %v1998_v53  ;;  %v2937_v36 = vpop.eup %2936 }
 0x692   :  { %v2048_v14 = vmul.f32 %v2937_v36, %v4186_v30 }
 0x693   :  { %v2399_v39 = vpack.c.bf16 %v2054_v22, %v2052_v13 }
 0x694   :  { %v2939_v32 = vpop.eup %2938 }
 0x695   :  { %2423 = vst [vmem:[#allocation11 + $0x68] sm:$0xff] %v2399_v39   ;;  %v2050_v28 = vmul.f32 %v2939_v32, %v4190_v4 }
 0x696   :  { %v2941_v46 = vpop.eup %2940 }
 0x697   :  { %v2394_v12 = vpack.c.bf16 %v2050_v28, %v2048_v14  ;;  %v2056_v55 = vmul.f32 %v2941_v46, %v4193_v1 }
 0x699   :  { %2422 = vst [vmem:[#allocation11 + $0x60] sm:$0xff] %v2394_v12  }
 0x69a   :  { %v2943_v24 = vpop.eup %2942 }
 0x69b   :  { %v2058_v11 = vmul.f32 %v2943_v24, %v4196_v47  ;;  %v2945_v9 = vpop.eup %2944 }
 0x69c   :  { %v2060_v42 = vmul.f32 %v2945_v9, %v4198_v7 }
 0x69d   :  { %v2404_v41 = vpack.c.bf16 %v2058_v11, %v2056_v55 }
 0x69e   :  { %v2947_v56 = vpop.eup %2946 }
 0x69f   :  { %2424 = vst [vmem:[#allocation11 + $0x70] sm:$0xff] %v2404_v41   ;;  %v2062_v30 = vmul.f32 %v2947_v56, %v4202_v40 }
 0x6a1   :  { %v2409_v43 = vpack.c.bf16 %v2062_v30, %v2060_v42 }
 0x6a3   :  { %2425 = vst [vmem:[#allocation11 + $0x78] sm:$0xff] %v2409_v43  }
 0x6a4   :  { %3060 = shalt.err (!%p3057_p1)
}
 0x6a5   :  { %2234 = dma.vmem_to_hbm [thread:$0]  %s2229_s23, 2048, %s4249_s6, [#allocation4], %s3078_s24, %s3078_s24, %s3079_s25  }
 0x6a6   :  { %3075 = dma.done.wait [#allocation4], 2048  }
 0x6a7   :  { %3076 = vsyncadd [#allocation4], 4294965248 }
 0x6a8   :  { %2238 = vsyncpa [#allocation3], 1 }
 0x6a9   :  { %2239 = vsyncpa [#allocation6], 1 }
 0x6aa   :  { %2240 = vsyncpa [#allocation9], 1 }
 0x6ab   :  { %2241 = vsyncpa [#allocation4], 1 }

</bundles_post_ra>
